<compile_context>
chip_gen: v6e
topology: v6e:2x2x1
jax: 0.10.0
libtpu: 0.0.40
codegen_flags: <defaults>
</compile_context>

<pallas_src>
import jax
import jax.numpy as jnp
from jax.experimental import pallas as pl
from jax.experimental.pallas import tpu as pltpu


def _round_up(x, m):
    return ((x + m - 1) // m) * m


def _choose_tb(batch, tb_max):
    """Sublane-aligned batch tile: large enough to feed the MXU rows, small
    enough to keep >= 4 grid steps (v7x megacore sharding + pipelining)."""
    tb = max(8, min(tb_max, _round_up(batch, 8)))
    while tb > 8 and _round_up(batch, tb) // tb < 4:
        tb //= 2
    return tb


# ---------------------------------------------------------------------------
# Pallas kernel: PIE-style probabilistic encoder head (TB batch elems / step)
# ---------------------------------------------------------------------------
def pie_encoder_kernel(
    feats_ref,      # (TB, C, N)  bf16  channel-first local features
    mask_ref,       # (TB, N)     f32   validity mask (1 = valid region/word)
    w_att_b_ref,    # (TB, 3, C)  bf16  fused scorers [att, att_sig, 0] (pre-broadcast)
    w_fc_sig_ref,   # (C, 2D)     bf16  fused pooled projections [w_fc | w_sig]
    w_fc2_ref,      # (C, D)      bf16  attention-residual projection (embedding)
    w_sig2_ref,     # (C, D)      bf16  attention-residual projection (uncertainty)
    b_fc_sig_ref,   # (1, 2D)     f32   fused biases [b_fc | b_sig]
    emb_pack_ref,   # (3, TB, D)  f32   out rows: [embedding, residual, logsigma]
    attn_pack_ref,  # (TB, 2, N)  f32   out rows: [attention, uncertainty attention]
):
    D = w_fc2_ref.shape[1]

    feats = feats_ref[...]                                   # (TB, C, N) bf16
    mask = mask_ref[...]                                     # (TB, N)    f32
    maskb = mask[:, None, :]                                 # (TB, 1, N)

    # Fused attention scores, rows = [att, att_sig, zero].  The zero row makes
    # the masked softmax produce uniform weights over valid positions, i.e. the
    # masked average pool, so ONE batched MXU matmul + ONE softmax covers the
    # embedding attention, the uncertainty attention and the average pool.
    scores = jnp.einsum("bsc,bcn->bsn", w_att_b_ref[...], feats,
                        preferred_element_type=jnp.float32)  # (TB, 3, N) f32
    scores = jnp.where(maskb > 0.0, scores, jnp.float32(-1e30))
    m = jnp.max(scores, axis=-1, keepdims=True)              # lane reduce (XLU)
    e = jnp.exp(scores - m) * maskb                          # EUP exp, f32
    denom = jnp.maximum(jnp.sum(e, axis=-1, keepdims=True), jnp.float32(1e-30))
    attn = e / denom                                         # exact softmax (torch parity)

    # All three pools in one batched MXU matmul (contract over N).
    pooled = jnp.einsum("bpn,bcn->bpc", attn.astype(jnp.bfloat16), feats,
                        preferred_element_type=jnp.float32)  # (TB, 3, C) f32

    att_pool = pooled[:, 0, :].astype(jnp.bfloat16)          # (TB, C)
    sig_pool = pooled[:, 1, :].astype(jnp.bfloat16)
    avg_pool = pooled[:, 2, :].astype(jnp.bfloat16)

    # Pooled-level projections (bf16 operands, f32 accumulation).
    base_sig = jnp.dot(avg_pool, w_fc_sig_ref[...],
                       preferred_element_type=jnp.float32) + b_fc_sig_ref[...]
    residual = jnp.dot(att_pool, w_fc2_ref[...],
                       preferred_element_type=jnp.float32)   # (TB, D)
    s_res = jnp.dot(sig_pool, w_sig2_ref[...],
                    preferred_element_type=jnp.float32)      # (TB, D)

    emb = base_sig[:, :D] + residual
    emb = emb * jax.lax.rsqrt(jnp.sum(emb * emb, axis=-1, keepdims=True)
                              + jnp.float32(1e-12))
    logsigma = base_sig[:, D:] + s_res

    # Branch-first packed embedding output: three contiguous (TB, D) stores.
    emb_pack_ref[0, :, :] = emb
    emb_pack_ref[1, :, :] = residual
    emb_pack_ref[2, :, :] = logsigma
    # Attention slab: rows 0-1 of the softmax (row 2 is the implicit avg pool).
    attn_pack_ref[...] = attn[:, :2, :]


# ---------------------------------------------------------------------------
# Wrapper: one pallas_call per modality (grid over batch tiles of size tb)
# ---------------------------------------------------------------------------
def pie_encode(feats_cf, mask, params, *, tb_max=32):
    """feats_cf: (B, C, N) channel-first local features; mask: (B, N) f32."""
    B, C, N = feats_cf.shape
    D = params["w_fc"].shape[1]

    tb = _choose_tb(B, tb_max)
    B_pad = _round_up(B, tb)

    feats_bf = feats_cf.astype(jnp.bfloat16)
    mask = mask.astype(jnp.float32)
    if B_pad != B:
        feats_bf = jnp.pad(feats_bf, ((0, B_pad - B), (0, 0), (0, 0)))
        mask = jnp.pad(mask, ((0, B_pad - B), (0, 0)))

    # Fused / pre-cast weights -- built once; constant blocks are fetched once
    # by the pipeline (index_map never changes).  The broadcast of the scorer
    # to (tb, 3, C) happens HERE, not per grid step inside the kernel.
    scorer = jnp.concatenate(
        [params["w_att"], params["w_att_sig"], jnp.zeros_like(params["w_att"])],
        axis=1).T                                                    # (3, C)
    w_att_b = jnp.broadcast_to(scorer[None], (tb, 3, C)).astype(jnp.bfloat16)
    w_fc_sig = jnp.concatenate([params["w_fc"], params["w_sig"]],
                               axis=1).astype(jnp.bfloat16)          # (C, 2D)
    w_fc2 = params["w_fc2"].astype(jnp.bfloat16)                     # (C, D)
    w_sig2 = params["w_sig2"].astype(jnp.bfloat16)                   # (C, D)
    b_fc_sig = jnp.concatenate([params["b_fc"], params["b_sig"]],
                               axis=1).astype(jnp.float32)           # (1, 2D)

    grid = (B_pad // tb,)
    in_specs = [
        pl.BlockSpec((tb, C, N), lambda i: (i, 0, 0)),       # feats (streamed)
        pl.BlockSpec((tb, N), lambda i: (i, 0)),             # mask  (streamed)
        pl.BlockSpec((tb, 3, C), lambda i: (0, 0, 0)),       # w_att_b  (constant)
        pl.BlockSpec((C, 2 * D), lambda i: (0, 0)),          # w_fc_sig (constant)
        pl.BlockSpec((C, D), lambda i: (0, 0)),              # w_fc2    (constant)
        pl.BlockSpec((C, D), lambda i: (0, 0)),              # w_sig2   (constant)
        pl.BlockSpec((1, 2 * D), lambda i: (0, 0)),          # b_fc_sig (constant)
    ]
    out_specs = (
        pl.BlockSpec((3, tb, D), lambda i: (0, i, 0)),       # [emb|residual|logsigma]
        pl.BlockSpec((tb, 2, N), lambda i: (i, 0, 0)),       # [attn|sattn]
    )
    out_shapes = (
        jax.ShapeDtypeStruct((3, B_pad, D), jnp.float32),
        jax.ShapeDtypeStruct((B_pad, 2, N), jnp.float32),
    )

    # Explicit VMEM budget: double-buffered streamed blocks + constant weights.
    vmem_bytes = (
        2 * tb * C * N * 2          # feats (bf16)
        + 2 * tb * N * 4            # mask
        + 2 * tb * 3 * C * 2        # w_att_b
        + 2 * C * 2 * D * 2         # w_fc_sig
        + 2 * 2 * C * D * 2         # w_fc2 + w_sig2
        + 2 * 2 * D * 4             # b_fc_sig
        + 2 * 3 * tb * D * 4        # emb_pack out
        + 2 * tb * 2 * N * 4        # attn_pack out
    )
    vmem_limit = int(min(max(vmem_bytes * 3 // 2 + (2 << 20), 16 << 20), 64 << 20))

    flops = 2 * B_pad * (3 * C * N          # fused attention scores
                         + 3 * N * C        # pooling
                         + C * 2 * D        # base/sigma projection
                         + 2 * C * D)       # residual projections
    bytes_accessed = (B_pad * C * N * 2 + B_pad * N * 4
                      + tb * 3 * C * 2 + C * 2 * D * 2 + 2 * C * D * 2 + 2 * D * 4
                      + 3 * B_pad * D * 4 + B_pad * 2 * N * 4)
    cost = pl.CostEstimate(flops=int(flops),
                           transcendentals=int(B_pad * 3 * N),
                           bytes_accessed=int(bytes_accessed))

    emb_pack, attn_pack = pl.pallas_call(
        pie_encoder_kernel,
        out_shape=out_shapes,
        grid=grid,
        in_specs=in_specs,
        out_specs=out_specs,
        compiler_params=pltpu.CompilerParams(
            dimension_semantics=("parallel",),     # batch tiles are independent
            vmem_limit_bytes=vmem_limit),
        cost_estimate=cost,
    )(feats_bf, mask, w_att_b, w_fc_sig, w_fc2, w_sig2, b_fc_sig)

    return {
        "embedding": emb_pack[0, :B, :],
        "residual": emb_pack[1, :B, :],
        "logsigma": emb_pack[2, :B, :],
        "attention": attn_pack[:B, 0, :],
        "uncertainty_attention": attn_pack[:B, 1, :],
    }


# ---------------------------------------------------------------------------
# PCME forward (config.not_bert == True path)
# ---------------------------------------------------------------------------
@jax.jit
def pcme_forward(images, sentences, lengths, img_params, txt_params,
                 embed_table):
    """images: (B, C, H, W) NCHW; sentences: (B, L) int32; lengths: (B,)."""
    B, C, H, W = images.shape

    # Image side: NCHW -> (B, C, N) is a free reshape -- the kernel consumes
    # channel-first features directly, so there is no HBM transpose.
    img_feats = images.reshape(B, C, H * W)
    img_mask = jnp.ones((B, H * W), jnp.float32)
    image_output = pie_encode(img_feats, img_mask, img_params)

    # Caption side: word-embedding lookup (glue) + channel-first PIE encoding.
    word_embs = jnp.take(embed_table, sentences, axis=0)        # (B, L, Wd)
    cap_feats = jnp.transpose(word_embs, (0, 2, 1))             # (B, Wd, L), tiny
    L = sentences.shape[1]
    cap_mask = (jnp.arange(L)[None, :] < lengths[:, None]).astype(jnp.float32)
    caption_output = pie_encode(cap_feats, cap_mask, txt_params)

    return {
        "image_features": image_output["embedding"],
        "image_attentions": image_output.get("attention"),
        "image_residuals": image_output.get("residual"),
        "image_logsigma": image_output.get("logsigma"),
        "image_logsigma_att": image_output.get("uncertainty_attention"),
        "caption_features": caption_output["embedding"],
        "caption_attentions": caption_output.get("attention"),
        "caption_residuals": caption_output.get("residual"),
        "caption_logsigma": caption_output.get("logsigma"),
        "caption_logsigma_att": caption_output.get("uncertainty_attention"),
    }


# ---------------------------------------------------------------------------
# Deterministic parameter init
# ---------------------------------------------------------------------------
def init_pie_params(key, in_dim, embed_dim):
    ks = jax.random.split(key, 6)
    scale = 1.0 / jnp.sqrt(jnp.float32(in_dim))
    return {
        "w_fc": jax.random.normal(ks[0], (in_dim, embed_dim), jnp.float32) * scale,
        "b_fc": jnp.zeros((1, embed_dim), jnp.float32),
        "w_att": jax.random.normal(ks[1], (in_dim, 1), jnp.float32) * scale,
        "w_fc2": jax.random.normal(ks[2], (in_dim, embed_dim), jnp.float32) * scale,
        "w_att_sig": jax.random.normal(ks[3], (in_dim, 1), jnp.float32) * scale,
        "w_sig": jax.random.normal(ks[4], (in_dim, embed_dim), jnp.float32) * scale,
        "b_sig": jnp.zeros((1, embed_dim), jnp.float32),
        "w_sig2": jax.random.normal(ks[5], (in_dim, embed_dim), jnp.float32) * scale,
    }


if __name__ == "__main__":
    key = jax.random.PRNGKey(0)
    B, C, H, W = 2, 4, 16, 16            # images NCHW
    L, vocab, word_dim, embed_dim = 8, 50, 16, 32

    k_img, k_txt, k_emb, k_x, k_s = jax.random.split(key, 5)
    img_params = init_pie_params(k_img, C, embed_dim)
    txt_params = init_pie_params(k_txt, word_dim, embed_dim)
    embed_table = jax.random.normal(k_emb, (vocab, word_dim), jnp.float32) * 0.1

    images = jax.random.normal(k_x, (B, C, H, W), jnp.float32)
    sentences = jax.random.randint(k_s, (B, L), 0, vocab, dtype=jnp.int32)
    lengths = jnp.array([8, 5], dtype=jnp.int32)
    # captions_word / BERT tokenizer path intentionally not used (not_bert=True).

    out = pcme_forward(images, sentences, lengths, img_params, txt_params,
                       embed_table)
    out = jax.block_until_ready(out)

    # Sanity: embeddings are l2-normalized, attentions sum to ~1, all finite.
    img_norm = jnp.linalg.norm(out["image_features"], axis=-1)
    cap_norm = jnp.linalg.norm(out["caption_features"], axis=-1)
    assert jnp.allclose(img_norm, 1.0, atol=1e-4)
    assert jnp.allclose(cap_norm, 1.0, atol=1e-4)
    assert jnp.allclose(jnp.sum(out["image_attentions"], axis=-1), 1.0, atol=1e-3)
    assert jnp.allclose(jnp.sum(out["caption_attentions"], axis=-1), 1.0, atol=1e-3)
    assert all(bool(jnp.all(jnp.isfinite(v))) for v in out.values())

    print("KERNEL_OK")
</pallas_src>

<mosaic_0001>
module attributes {stable_mosaic.version = 11 : i64} {
  func.func @pie_encoder_kernel(%arg0: i32, %arg1: memref<8x4x256xbf16, #tpu.memory_space<vmem>>, %arg2: memref<8x256xf32, #tpu.memory_space<vmem>>, %arg3: memref<8x3x4xbf16, #tpu.memory_space<vmem>>, %arg4: memref<4x64xbf16, #tpu.memory_space<vmem>>, %arg5: memref<4x32xbf16, #tpu.memory_space<vmem>>, %arg6: memref<4x32xbf16, #tpu.memory_space<vmem>>, %arg7: memref<1x64xf32, #tpu.memory_space<vmem>>, %arg8: memref<3x8x32xf32, #tpu.memory_space<vmem>>, %arg9: memref<8x2x256xf32, #tpu.memory_space<vmem>>) attributes {dimension_semantics = [#tpu.dimension_semantics<parallel>], iteration_bounds = array<i64: 1>, scalar_prefetch = 0 : i64, scratch_operands = 0 : i64, tpu.core_type = #tpu.core_type<tc>, window_params = [{transform_indices = @transform_0, window_bounds = array<i64: 8, 4, 256>}, {transform_indices = @transform_1, window_bounds = array<i64: 8, 256>}, {pipeline_mode = #tpu.pipeline_mode<synchronous>, transform_indices = @transform_2, window_bounds = array<i64: 8, 3, 4>}, {pipeline_mode = #tpu.pipeline_mode<synchronous>, transform_indices = @transform_3, window_bounds = array<i64: 4, 64>}, {pipeline_mode = #tpu.pipeline_mode<synchronous>, transform_indices = @transform_4, window_bounds = array<i64: 4, 32>}, {pipeline_mode = #tpu.pipeline_mode<synchronous>, transform_indices = @transform_5, window_bounds = array<i64: 4, 32>}, {pipeline_mode = #tpu.pipeline_mode<synchronous>, transform_indices = @transform_6, window_bounds = array<i64: 1, 64>}, {transform_indices = @transform_7, window_bounds = array<i64: 3, 8, 32>}, {transform_indices = @transform_8, window_bounds = array<i64: 8, 2, 256>}]} {
    %c0 = arith.constant 0 : index
    %c0_0 = arith.constant 0 : index
    %c0_1 = arith.constant 0 : index
    %0 = vector.load %arg1[%c0, %c0_0, %c0_1] : memref<8x4x256xbf16, #tpu.memory_space<vmem>>, vector<8x4x256xbf16>
    %c0_2 = arith.constant 0 : index
    %c0_3 = arith.constant 0 : index
    %1 = vector.load %arg2[%c0_2, %c0_3] : memref<8x256xf32, #tpu.memory_space<vmem>>, vector<8x256xf32>
    %2 = vector.shape_cast %1 : vector<8x256xf32> to vector<8x1x256xf32>
    %c0_4 = arith.constant 0 : index
    %c0_5 = arith.constant 0 : index
    %c0_6 = arith.constant 0 : index
    %3 = vector.load %arg3[%c0_4, %c0_5, %c0_6] : memref<8x3x4xbf16, #tpu.memory_space<vmem>>, vector<8x3x4xbf16>
    "tpu.trace_start"() <{level = 10 : i32, message = "bsc,bcn->bsn"}> : () -> ()
    %cst = arith.constant dense<0.000000e+00> : vector<8x3x256xf32>
    %4 = tpu.matmul %3, %0, %cst {dimension_numbers = #tpu.dot_dimension_numbers<[2], [1], [1], [2], [0, 0, 0, 1, 1, 2], [0], [0]>} : vector<8x3x4xbf16>, vector<8x4x256xbf16>, vector<8x3x256xf32> -> vector<8x3x256xf32>
    %cst_7 = arith.constant 0.000000e+00 : f32
    "tpu.trace_stop"() : () -> ()
    %5 = vector.broadcast %cst_7 : f32 to vector<8x1x256xf32>
    %6 = arith.cmpf ogt, %2, %5 : vector<8x1x256xf32>
    %cst_8 = arith.constant -1.000000e+30 : f32
    %7 = vector.shape_cast %6 : vector<8x1x256xi1> to vector<8x1x256xi1>
    %8 = vector.broadcast %7 : vector<8x1x256xi1> to vector<8x3x256xi1>
    %9 = vector.broadcast %cst_8 : f32 to vector<8x3x256xf32>
    %10 = arith.select %8, %4, %9 : vector<8x3x256xi1>, vector<8x3x256xf32>
    %cst_9 = arith.constant dense<0xFF800000> : vector<8x3xf32>
    %11 = vector.multi_reduction <maximumf>, %10, %cst_9 [2] : vector<8x3x256xf32> to vector<8x3xf32>
    %12 = vector.shape_cast %11 : vector<8x3xf32> to vector<8x3x1xf32>
    %13 = vector.broadcast %12 : vector<8x3x1xf32> to vector<8x3x256xf32>
    %14 = arith.subf %10, %13 : vector<8x3x256xf32>
    %15 = math.exp %14 : vector<8x3x256xf32>
    %16 = vector.broadcast %2 : vector<8x1x256xf32> to vector<8x3x256xf32>
    %17 = arith.mulf %15, %16 : vector<8x3x256xf32>
    %cst_10 = arith.constant dense<0.000000e+00> : vector<8x3xf32>
    %18 = vector.multi_reduction <add>, %17, %cst_10 [2] : vector<8x3x256xf32> to vector<8x3xf32>
    %19 = vector.shape_cast %18 : vector<8x3xf32> to vector<8x3x1xf32>
    %cst_11 = arith.constant 1.000000e-30 : f32
    %20 = vector.broadcast %cst_11 : f32 to vector<8x3x1xf32>
    %21 = arith.maximumf %19, %20 : vector<8x3x1xf32>
    %22 = vector.broadcast %21 : vector<8x3x1xf32> to vector<8x3x256xf32>
    %23 = arith.divf %17, %22 : vector<8x3x256xf32>
    %24 = arith.truncf %23 : vector<8x3x256xf32> to vector<8x3x256xbf16>
    "tpu.trace_start"() <{level = 10 : i32, message = "bpn,bcn->bpc"}> : () -> ()
    %cst_12 = arith.constant dense<0.000000e+00> : vector<8x3x4xf32>
    %25 = tpu.matmul %24, %0, %cst_12 {dimension_numbers = #tpu.dot_dimension_numbers<[2], [2], [1], [1], [0, 0, 0, 1, 1, 1], [0], [0]>} : vector<8x3x256xbf16>, vector<8x4x256xbf16>, vector<8x3x4xf32> -> vector<8x3x4xf32>
    "tpu.trace_stop"() : () -> ()
    %26 = vector.extract_strided_slice %25 {offsets = [0, 0, 0], sizes = [8, 1, 4], strides = [1, 1, 1]} : vector<8x3x4xf32> to vector<8x1x4xf32>
    %27 = vector.shape_cast %26 : vector<8x1x4xf32> to vector<8x4xf32>
    %28 = arith.truncf %27 : vector<8x4xf32> to vector<8x4xbf16>
    %29 = vector.extract_strided_slice %25 {offsets = [0, 1, 0], sizes = [8, 1, 4], strides = [1, 1, 1]} : vector<8x3x4xf32> to vector<8x1x4xf32>
    %30 = vector.shape_cast %29 : vector<8x1x4xf32> to vector<8x4xf32>
    %31 = arith.truncf %30 : vector<8x4xf32> to vector<8x4xbf16>
    %32 = vector.extract_strided_slice %25 {offsets = [0, 2, 0], sizes = [8, 1, 4], strides = [1, 1, 1]} : vector<8x3x4xf32> to vector<8x1x4xf32>
    %33 = vector.shape_cast %32 : vector<8x1x4xf32> to vector<8x4xf32>
    %34 = arith.truncf %33 : vector<8x4xf32> to vector<8x4xbf16>
    %c0_13 = arith.constant 0 : index
    %c0_14 = arith.constant 0 : index
    %35 = vector.load %arg4[%c0_13, %c0_14] : memref<4x64xbf16, #tpu.memory_space<vmem>>, vector<4x64xbf16>
    %cst_15 = arith.constant dense<0.000000e+00> : vector<8x64xf32>
    %36 = tpu.matmul %34, %35, %cst_15 {dimension_numbers = #tpu.dot_dimension_numbers<[1], [0], [0], [1], [0, 0, 1, 1], [], []>} : vector<8x4xbf16>, vector<4x64xbf16>, vector<8x64xf32> -> vector<8x64xf32>
    %c0_16 = arith.constant 0 : index
    %c0_17 = arith.constant 0 : index
    %37 = vector.load %arg7[%c0_16, %c0_17] : memref<1x64xf32, #tpu.memory_space<vmem>>, vector<1x64xf32>
    %38 = vector.broadcast %37 : vector<1x64xf32> to vector<8x64xf32>
    %39 = arith.addf %36, %38 : vector<8x64xf32>
    %c0_18 = arith.constant 0 : index
    %c0_19 = arith.constant 0 : index
    %40 = vector.load %arg5[%c0_18, %c0_19] : memref<4x32xbf16, #tpu.memory_space<vmem>>, vector<4x32xbf16>
    %cst_20 = arith.constant dense<0.000000e+00> : vector<8x32xf32>
    %41 = tpu.matmul %28, %40, %cst_20 {dimension_numbers = #tpu.dot_dimension_numbers<[1], [0], [0], [1], [0, 0, 1, 1], [], []>} : vector<8x4xbf16>, vector<4x32xbf16>, vector<8x32xf32> -> vector<8x32xf32>
    %c0_21 = arith.constant 0 : index
    %c0_22 = arith.constant 0 : index
    %42 = vector.load %arg6[%c0_21, %c0_22] : memref<4x32xbf16, #tpu.memory_space<vmem>>, vector<4x32xbf16>
    %cst_23 = arith.constant dense<0.000000e+00> : vector<8x32xf32>
    %43 = tpu.matmul %31, %42, %cst_23 {dimension_numbers = #tpu.dot_dimension_numbers<[1], [0], [0], [1], [0, 0, 1, 1], [], []>} : vector<8x4xbf16>, vector<4x32xbf16>, vector<8x32xf32> -> vector<8x32xf32>
    %44 = vector.extract_strided_slice %39 {offsets = [0, 0], sizes = [8, 32], strides = [1, 1]} : vector<8x64xf32> to vector<8x32xf32>
    %45 = arith.addf %44, %41 : vector<8x32xf32>
    %46 = arith.mulf %45, %45 : vector<8x32xf32>
    %cst_24 = arith.constant dense<0.000000e+00> : vector<8xf32>
    %47 = vector.multi_reduction <add>, %46, %cst_24 [1] : vector<8x32xf32> to vector<8xf32>
    %48 = vector.shape_cast %47 : vector<8xf32> to vector<8x1xf32>
    %cst_25 = arith.constant 9.99999996E-13 : f32
    %49 = vector.broadcast %cst_25 : f32 to vector<8x1xf32>
    %50 = arith.addf %48, %49 : vector<8x1xf32>
    %51 = math.rsqrt %50 : vector<8x1xf32>
    %52 = vector.broadcast %51 : vector<8x1xf32> to vector<8x32xf32>
    %53 = arith.mulf %45, %52 : vector<8x32xf32>
    %54 = vector.extract_strided_slice %39 {offsets = [0, 32], sizes = [8, 32], strides = [1, 1]} : vector<8x64xf32> to vector<8x32xf32>
    %55 = arith.addf %54, %43 : vector<8x32xf32>
    %c0_26 = arith.constant 0 : index
    %c0_27 = arith.constant 0 : index
    %c0_28 = arith.constant 0 : index
    %56 = vector.load %arg8[%c0_26, %c0_27, %c0_28] : memref<3x8x32xf32, #tpu.memory_space<vmem>>, vector<1x8x32xf32>
    %57 = vector.shape_cast %56 : vector<1x8x32xf32> to vector<8x32xf32>
    %58 = vector.shape_cast %53 : vector<8x32xf32> to vector<1x8x32xf32>
    tpu.vector_store %arg8[%c0_26, %c0_27, %c0_28], %58 {strides = array<i32>} : memref<3x8x32xf32, #tpu.memory_space<vmem>>, vector<1x8x32xf32>,
    %c1 = arith.constant 1 : index
    %c0_29 = arith.constant 0 : index
    %c0_30 = arith.constant 0 : index
    %59 = vector.load %arg8[%c1, %c0_29, %c0_30] : memref<3x8x32xf32, #tpu.memory_space<vmem>>, vector<1x8x32xf32>
    %60 = vector.shape_cast %59 : vector<1x8x32xf32> to vector<8x32xf32>
    %61 = vector.shape_cast %41 : vector<8x32xf32> to vector<1x8x32xf32>
    tpu.vector_store %arg8[%c1, %c0_29, %c0_30], %61 {strides = array<i32>} : memref<3x8x32xf32, #tpu.memory_space<vmem>>, vector<1x8x32xf32>,
    %c2 = arith.constant 2 : index
    %c0_31 = arith.constant 0 : index
    %c0_32 = arith.constant 0 : index
    %62 = vector.load %arg8[%c2, %c0_31, %c0_32] : memref<3x8x32xf32, #tpu.memory_space<vmem>>, vector<1x8x32xf32>
    %63 = vector.shape_cast %62 : vector<1x8x32xf32> to vector<8x32xf32>
    %64 = vector.shape_cast %55 : vector<8x32xf32> to vector<1x8x32xf32>
    tpu.vector_store %arg8[%c2, %c0_31, %c0_32], %64 {strides = array<i32>} : memref<3x8x32xf32, #tpu.memory_space<vmem>>, vector<1x8x32xf32>,
    %65 = vector.extract_strided_slice %23 {offsets = [0, 0, 0], sizes = [8, 2, 256], strides = [1, 1, 1]} : vector<8x3x256xf32> to vector<8x2x256xf32>
    %c0_33 = arith.constant 0 : index
    %c0_34 = arith.constant 0 : index
    %c0_35 = arith.constant 0 : index
    %66 = vector.load %arg9[%c0_33, %c0_34, %c0_35] : memref<8x2x256xf32, #tpu.memory_space<vmem>>, vector<8x2x256xf32>
    tpu.vector_store %arg9[%c0_33, %c0_34, %c0_35], %65 {strides = array<i32>} : memref<8x2x256xf32, #tpu.memory_space<vmem>>, vector<8x2x256xf32>,
    return
  }
  func.func @transform_0(%arg0: i32) -> (i32, i32, i32) {
    %c0_i32 = arith.constant 0 : i32
    %c0_i32_0 = arith.constant 0 : i32
    %c0_i32_1 = arith.constant 0 : i32
    return %arg0, %c0_i32, %c0_i32_0 : i32, i32, i32
  }
  func.func @transform_1(%arg0: i32) -> (i32, i32) {
    %c0_i32 = arith.constant 0 : i32
    %c0_i32_0 = arith.constant 0 : i32
    return %arg0, %c0_i32 : i32, i32
  }
  func.func @transform_2(%arg0: i32) -> (i32, i32, i32) {
    %c0_i32 = arith.constant 0 : i32
    %c0_i32_0 = arith.constant 0 : i32
    %c0_i32_1 = arith.constant 0 : i32
    %c0_i32_2 = arith.constant 0 : i32
    return %c0_i32, %c0_i32_0, %c0_i32_1 : i32, i32, i32
  }
  func.func @transform_3(%arg0: i32) -> (i32, i32) {
    %c0_i32 = arith.constant 0 : i32
    %c0_i32_0 = arith.constant 0 : i32
    %c0_i32_1 = arith.constant 0 : i32
    return %c0_i32, %c0_i32_0 : i32, i32
  }
  func.func @transform_4(%arg0: i32) -> (i32, i32) {
    %c0_i32 = arith.constant 0 : i32
    %c0_i32_0 = arith.constant 0 : i32
    %c0_i32_1 = arith.constant 0 : i32
    return %c0_i32, %c0_i32_0 : i32, i32
  }
  func.func @transform_5(%arg0: i32) -> (i32, i32) {
    %c0_i32 = arith.constant 0 : i32
    %c0_i32_0 = arith.constant 0 : i32
    %c0_i32_1 = arith.constant 0 : i32
    return %c0_i32, %c0_i32_0 : i32, i32
  }
  func.func @transform_6(%arg0: i32) -> (i32, i32) {
    %c0_i32 = arith.constant 0 : i32
    %c0_i32_0 = arith.constant 0 : i32
    %c0_i32_1 = arith.constant 0 : i32
    return %c0_i32, %c0_i32_0 : i32, i32
  }
  func.func @transform_7(%arg0: i32) -> (i32, i32, i32) {
    %c0_i32 = arith.constant 0 : i32
    %c0_i32_0 = arith.constant 0 : i32
    %c0_i32_1 = arith.constant 0 : i32
    return %c0_i32, %arg0, %c0_i32_0 : i32, i32, i32
  }
  func.func @transform_8(%arg0: i32) -> (i32, i32, i32) {
    %c0_i32 = arith.constant 0 : i32
    %c0_i32_0 = arith.constant 0 : i32
    %c0_i32_1 = arith.constant 0 : i32
    return %arg0, %c0_i32, %c0_i32_0 : i32, i32, i32
  }
}

module attributes {stable_mosaic.version = 11 : i64} {
  func.func @pie_encoder_kernel(%arg0: i32, %arg1: memref<8x16x8xbf16, #tpu.memory_space<vmem>>, %arg2: memref<8x8xf32, #tpu.memory_space<vmem>>, %arg3: memref<8x3x16xbf16, #tpu.memory_space<vmem>>, %arg4: memref<16x64xbf16, #tpu.memory_space<vmem>>, %arg5: memref<16x32xbf16, #tpu.memory_space<vmem>>, %arg6: memref<16x32xbf16, #tpu.memory_space<vmem>>, %arg7: memref<1x64xf32, #tpu.memory_space<vmem>>, %arg8: memref<3x8x32xf32, #tpu.memory_space<vmem>>, %arg9: memref<8x2x8xf32, #tpu.memory_space<vmem>>) attributes {dimension_semantics = [#tpu.dimension_semantics<parallel>], iteration_bounds = array<i64: 1>, scalar_prefetch = 0 : i64, scratch_operands = 0 : i64, tpu.core_type = #tpu.core_type<tc>, window_params = [{transform_indices = @transform_0, window_bounds = array<i64: 8, 16, 8>}, {transform_indices = @transform_1, window_bounds = array<i64: 8, 8>}, {pipeline_mode = #tpu.pipeline_mode<synchronous>, transform_indices = @transform_2, window_bounds = array<i64: 8, 3, 16>}, {pipeline_mode = #tpu.pipeline_mode<synchronous>, transform_indices = @transform_3, window_bounds = array<i64: 16, 64>}, {pipeline_mode = #tpu.pipeline_mode<synchronous>, transform_indices = @transform_4, window_bounds = array<i64: 16, 32>}, {pipeline_mode = #tpu.pipeline_mode<synchronous>, transform_indices = @transform_5, window_bounds = array<i64: 16, 32>}, {pipeline_mode = #tpu.pipeline_mode<synchronous>, transform_indices = @transform_6, window_bounds = array<i64: 1, 64>}, {transform_indices = @transform_7, window_bounds = array<i64: 3, 8, 32>}, {transform_indices = @transform_8, window_bounds = array<i64: 8, 2, 8>}]} {
    %c0 = arith.constant 0 : index
    %c0_0 = arith.constant 0 : index
    %c0_1 = arith.constant 0 : index
    %0 = vector.load %arg1[%c0, %c0_0, %c0_1] : memref<8x16x8xbf16, #tpu.memory_space<vmem>>, vector<8x16x8xbf16>
    %c0_2 = arith.constant 0 : index
    %c0_3 = arith.constant 0 : index
    %1 = vector.load %arg2[%c0_2, %c0_3] : memref<8x8xf32, #tpu.memory_space<vmem>>, vector<8x8xf32>
    %2 = vector.shape_cast %1 : vector<8x8xf32> to vector<8x1x8xf32>
    %c0_4 = arith.constant 0 : index
    %c0_5 = arith.constant 0 : index
    %c0_6 = arith.constant 0 : index
    %3 = vector.load %arg3[%c0_4, %c0_5, %c0_6] : memref<8x3x16xbf16, #tpu.memory_space<vmem>>, vector<8x3x16xbf16>
    "tpu.trace_start"() <{level = 10 : i32, message = "bsc,bcn->bsn"}> : () -> ()
    %cst = arith.constant dense<0.000000e+00> : vector<8x3x8xf32>
    %4 = tpu.matmul %3, %0, %cst {dimension_numbers = #tpu.dot_dimension_numbers<[2], [1], [1], [2], [0, 0, 0, 1, 1, 2], [0], [0]>} : vector<8x3x16xbf16>, vector<8x16x8xbf16>, vector<8x3x8xf32> -> vector<8x3x8xf32>
    %cst_7 = arith.constant 0.000000e+00 : f32
    "tpu.trace_stop"() : () -> ()
    %5 = vector.broadcast %cst_7 : f32 to vector<8x1x8xf32>
    %6 = arith.cmpf ogt, %2, %5 : vector<8x1x8xf32>
    %cst_8 = arith.constant -1.000000e+30 : f32
    %7 = vector.shape_cast %6 : vector<8x1x8xi1> to vector<8x1x8xi1>
    %8 = vector.broadcast %7 : vector<8x1x8xi1> to vector<8x3x8xi1>
    %9 = vector.broadcast %cst_8 : f32 to vector<8x3x8xf32>
    %10 = arith.select %8, %4, %9 : vector<8x3x8xi1>, vector<8x3x8xf32>
    %cst_9 = arith.constant dense<0xFF800000> : vector<8x3xf32>
    %11 = vector.multi_reduction <maximumf>, %10, %cst_9 [2] : vector<8x3x8xf32> to vector<8x3xf32>
    %12 = vector.shape_cast %11 : vector<8x3xf32> to vector<8x3x1xf32>
    %13 = vector.broadcast %12 : vector<8x3x1xf32> to vector<8x3x8xf32>
    %14 = arith.subf %10, %13 : vector<8x3x8xf32>
    %15 = math.exp %14 : vector<8x3x8xf32>
    %16 = vector.broadcast %2 : vector<8x1x8xf32> to vector<8x3x8xf32>
    %17 = arith.mulf %15, %16 : vector<8x3x8xf32>
    %cst_10 = arith.constant dense<0.000000e+00> : vector<8x3xf32>
    %18 = vector.multi_reduction <add>, %17, %cst_10 [2] : vector<8x3x8xf32> to vector<8x3xf32>
    %19 = vector.shape_cast %18 : vector<8x3xf32> to vector<8x3x1xf32>
    %cst_11 = arith.constant 1.000000e-30 : f32
    %20 = vector.broadcast %cst_11 : f32 to vector<8x3x1xf32>
    %21 = arith.maximumf %19, %20 : vector<8x3x1xf32>
    %22 = vector.broadcast %21 : vector<8x3x1xf32> to vector<8x3x8xf32>
    %23 = arith.divf %17, %22 : vector<8x3x8xf32>
    %24 = arith.truncf %23 : vector<8x3x8xf32> to vector<8x3x8xbf16>
    "tpu.trace_start"() <{level = 10 : i32, message = "bpn,bcn->bpc"}> : () -> ()
    %cst_12 = arith.constant dense<0.000000e+00> : vector<8x3x16xf32>
    %25 = tpu.matmul %24, %0, %cst_12 {dimension_numbers = #tpu.dot_dimension_numbers<[2], [2], [1], [1], [0, 0, 0, 1, 1, 1], [0], [0]>} : vector<8x3x8xbf16>, vector<8x16x8xbf16>, vector<8x3x16xf32> -> vector<8x3x16xf32>
    "tpu.trace_stop"() : () -> ()
    %26 = vector.extract_strided_slice %25 {offsets = [0, 0, 0], sizes = [8, 1, 16], strides = [1, 1, 1]} : vector<8x3x16xf32> to vector<8x1x16xf32>
    %27 = vector.shape_cast %26 : vector<8x1x16xf32> to vector<8x16xf32>
    %28 = arith.truncf %27 : vector<8x16xf32> to vector<8x16xbf16>
    %29 = vector.extract_strided_slice %25 {offsets = [0, 1, 0], sizes = [8, 1, 16], strides = [1, 1, 1]} : vector<8x3x16xf32> to vector<8x1x16xf32>
    %30 = vector.shape_cast %29 : vector<8x1x16xf32> to vector<8x16xf32>
    %31 = arith.truncf %30 : vector<8x16xf32> to vector<8x16xbf16>
    %32 = vector.extract_strided_slice %25 {offsets = [0, 2, 0], sizes = [8, 1, 16], strides = [1, 1, 1]} : vector<8x3x16xf32> to vector<8x1x16xf32>
    %33 = vector.shape_cast %32 : vector<8x1x16xf32> to vector<8x16xf32>
    %34 = arith.truncf %33 : vector<8x16xf32> to vector<8x16xbf16>
    %c0_13 = arith.constant 0 : index
    %c0_14 = arith.constant 0 : index
    %35 = vector.load %arg4[%c0_13, %c0_14] : memref<16x64xbf16, #tpu.memory_space<vmem>>, vector<16x64xbf16>
    %cst_15 = arith.constant dense<0.000000e+00> : vector<8x64xf32>
    %36 = tpu.matmul %34, %35, %cst_15 {dimension_numbers = #tpu.dot_dimension_numbers<[1], [0], [0], [1], [0, 0, 1, 1], [], []>} : vector<8x16xbf16>, vector<16x64xbf16>, vector<8x64xf32> -> vector<8x64xf32>
    %c0_16 = arith.constant 0 : index
    %c0_17 = arith.constant 0 : index
    %37 = vector.load %arg7[%c0_16, %c0_17] : memref<1x64xf32, #tpu.memory_space<vmem>>, vector<1x64xf32>
    %38 = vector.broadcast %37 : vector<1x64xf32> to vector<8x64xf32>
    %39 = arith.addf %36, %38 : vector<8x64xf32>
    %c0_18 = arith.constant 0 : index
    %c0_19 = arith.constant 0 : index
    %40 = vector.load %arg5[%c0_18, %c0_19] : memref<16x32xbf16, #tpu.memory_space<vmem>>, vector<16x32xbf16>
    %cst_20 = arith.constant dense<0.000000e+00> : vector<8x32xf32>
    %41 = tpu.matmul %28, %40, %cst_20 {dimension_numbers = #tpu.dot_dimension_numbers<[1], [0], [0], [1], [0, 0, 1, 1], [], []>} : vector<8x16xbf16>, vector<16x32xbf16>, vector<8x32xf32> -> vector<8x32xf32>
    %c0_21 = arith.constant 0 : index
    %c0_22 = arith.constant 0 : index
    %42 = vector.load %arg6[%c0_21, %c0_22] : memref<16x32xbf16, #tpu.memory_space<vmem>>, vector<16x32xbf16>
    %cst_23 = arith.constant dense<0.000000e+00> : vector<8x32xf32>
    %43 = tpu.matmul %31, %42, %cst_23 {dimension_numbers = #tpu.dot_dimension_numbers<[1], [0], [0], [1], [0, 0, 1, 1], [], []>} : vector<8x16xbf16>, vector<16x32xbf16>, vector<8x32xf32> -> vector<8x32xf32>
    %44 = vector.extract_strided_slice %39 {offsets = [0, 0], sizes = [8, 32], strides = [1, 1]} : vector<8x64xf32> to vector<8x32xf32>
    %45 = arith.addf %44, %41 : vector<8x32xf32>
    %46 = arith.mulf %45, %45 : vector<8x32xf32>
    %cst_24 = arith.constant dense<0.000000e+00> : vector<8xf32>
    %47 = vector.multi_reduction <add>, %46, %cst_24 [1] : vector<8x32xf32> to vector<8xf32>
    %48 = vector.shape_cast %47 : vector<8xf32> to vector<8x1xf32>
    %cst_25 = arith.constant 9.99999996E-13 : f32
    %49 = vector.broadcast %cst_25 : f32 to vector<8x1xf32>
    %50 = arith.addf %48, %49 : vector<8x1xf32>
    %51 = math.rsqrt %50 : vector<8x1xf32>
    %52 = vector.broadcast %51 : vector<8x1xf32> to vector<8x32xf32>
    %53 = arith.mulf %45, %52 : vector<8x32xf32>
    %54 = vector.extract_strided_slice %39 {offsets = [0, 32], sizes = [8, 32], strides = [1, 1]} : vector<8x64xf32> to vector<8x32xf32>
    %55 = arith.addf %54, %43 : vector<8x32xf32>
    %c0_26 = arith.constant 0 : index
    %c0_27 = arith.constant 0 : index
    %c0_28 = arith.constant 0 : index
    %56 = vector.load %arg8[%c0_26, %c0_27, %c0_28] : memref<3x8x32xf32, #tpu.memory_space<vmem>>, vector<1x8x32xf32>
    %57 = vector.shape_cast %56 : vector<1x8x32xf32> to vector<8x32xf32>
    %58 = vector.shape_cast %53 : vector<8x32xf32> to vector<1x8x32xf32>
    tpu.vector_store %arg8[%c0_26, %c0_27, %c0_28], %58 {strides = array<i32>} : memref<3x8x32xf32, #tpu.memory_space<vmem>>, vector<1x8x32xf32>,
    %c1 = arith.constant 1 : index
    %c0_29 = arith.constant 0 : index
    %c0_30 = arith.constant 0 : index
    %59 = vector.load %arg8[%c1, %c0_29, %c0_30] : memref<3x8x32xf32, #tpu.memory_space<vmem>>, vector<1x8x32xf32>
    %60 = vector.shape_cast %59 : vector<1x8x32xf32> to vector<8x32xf32>
    %61 = vector.shape_cast %41 : vector<8x32xf32> to vector<1x8x32xf32>
    tpu.vector_store %arg8[%c1, %c0_29, %c0_30], %61 {strides = array<i32>} : memref<3x8x32xf32, #tpu.memory_space<vmem>>, vector<1x8x32xf32>,
    %c2 = arith.constant 2 : index
    %c0_31 = arith.constant 0 : index
    %c0_32 = arith.constant 0 : index
    %62 = vector.load %arg8[%c2, %c0_31, %c0_32] : memref<3x8x32xf32, #tpu.memory_space<vmem>>, vector<1x8x32xf32>
    %63 = vector.shape_cast %62 : vector<1x8x32xf32> to vector<8x32xf32>
    %64 = vector.shape_cast %55 : vector<8x32xf32> to vector<1x8x32xf32>
    tpu.vector_store %arg8[%c2, %c0_31, %c0_32], %64 {strides = array<i32>} : memref<3x8x32xf32, #tpu.memory_space<vmem>>, vector<1x8x32xf32>,
    %65 = vector.extract_strided_slice %23 {offsets = [0, 0, 0], sizes = [8, 2, 8], strides = [1, 1, 1]} : vector<8x3x8xf32> to vector<8x2x8xf32>
    %c0_33 = arith.constant 0 : index
    %c0_34 = arith.constant 0 : index
    %c0_35 = arith.constant 0 : index
    %66 = vector.load %arg9[%c0_33, %c0_34, %c0_35] : memref<8x2x8xf32, #tpu.memory_space<vmem>>, vector<8x2x8xf32>
    tpu.vector_store %arg9[%c0_33, %c0_34, %c0_35], %65 {strides = array<i32>} : memref<8x2x8xf32, #tpu.memory_space<vmem>>, vector<8x2x8xf32>,
    return
  }
  func.func @transform_0(%arg0: i32) -> (i32, i32, i32) {
    %c0_i32 = arith.constant 0 : i32
    %c0_i32_0 = arith.constant 0 : i32
    %c0_i32_1 = arith.constant 0 : i32
    return %arg0, %c0_i32, %c0_i32_0 : i32, i32, i32
  }
  func.func @transform_1(%arg0: i32) -> (i32, i32) {
    %c0_i32 = arith.constant 0 : i32
    %c0_i32_0 = arith.constant 0 : i32
    return %arg0, %c0_i32 : i32, i32
  }
  func.func @transform_2(%arg0: i32) -> (i32, i32, i32) {
    %c0_i32 = arith.constant 0 : i32
    %c0_i32_0 = arith.constant 0 : i32
    %c0_i32_1 = arith.constant 0 : i32
    %c0_i32_2 = arith.constant 0 : i32
    return %c0_i32, %c0_i32_0, %c0_i32_1 : i32, i32, i32
  }
  func.func @transform_3(%arg0: i32) -> (i32, i32) {
    %c0_i32 = arith.constant 0 : i32
    %c0_i32_0 = arith.constant 0 : i32
    %c0_i32_1 = arith.constant 0 : i32
    return %c0_i32, %c0_i32_0 : i32, i32
  }
  func.func @transform_4(%arg0: i32) -> (i32, i32) {
    %c0_i32 = arith.constant 0 : i32
    %c0_i32_0 = arith.constant 0 : i32
    %c0_i32_1 = arith.constant 0 : i32
    return %c0_i32, %c0_i32_0 : i32, i32
  }
  func.func @transform_5(%arg0: i32) -> (i32, i32) {
    %c0_i32 = arith.constant 0 : i32
    %c0_i32_0 = arith.constant 0 : i32
    %c0_i32_1 = arith.constant 0 : i32
    return %c0_i32, %c0_i32_0 : i32, i32
  }
  func.func @transform_6(%arg0: i32) -> (i32, i32) {
    %c0_i32 = arith.constant 0 : i32
    %c0_i32_0 = arith.constant 0 : i32
    %c0_i32_1 = arith.constant 0 : i32
    return %c0_i32, %c0_i32_0 : i32, i32
  }
  func.func @transform_7(%arg0: i32) -> (i32, i32, i32) {
    %c0_i32 = arith.constant 0 : i32
    %c0_i32_0 = arith.constant 0 : i32
    %c0_i32_1 = arith.constant 0 : i32
    return %c0_i32, %arg0, %c0_i32_0 : i32, i32, i32
  }
  func.func @transform_8(%arg0: i32) -> (i32, i32, i32) {
    %c0_i32 = arith.constant 0 : i32
    %c0_i32_0 = arith.constant 0 : i32
    %c0_i32_1 = arith.constant 0 : i32
    return %arg0, %c0_i32, %c0_i32_0 : i32, i32, i32
  }
}

</mosaic_0001>

<bundles_post_ra>
// kernel: pcme_forward.2
= control target key start
LH: loop header
LB: loop body
LE: loop exit
PB: predicated region body
PF: predicated region fallthrough
CT: control target
= control target key end

     0   :  { %vm120_vm0 = vcmask 1041408   ;;  %v1774_v1 = vmov 0   ;;  %vm116_vm1 = vcmask 31744   ;;  %v1775_v33 = vmov 1966171168   ;;  %s1779_s15 = smov 96   ;;  %s2337_s0 = inlined_call_operand.vmem [shape: bf16[8,4,256], index: 0, kind: input, shape index: {}]   ;;  %s2338_s2 = inlined_call_operand.vmem [shape: bf16[8,3,4], index: 2, kind: input, shape index: {}]   ;;  %s2339_s1 = inlined_call_operand.vmem [shape: f32[8,256], index: 1, kind: input, shape index: {}]   ;;  %s2340_s8 = inlined_call_operand.vmem [shape: f32[8,2,256], index: 8, kind: output, shape index: {1}]   ;;  %s2341_s3 = inlined_call_operand.vmem [shape: bf16[4,64], index: 3, kind: input, shape index: {}]   ;;  %s2342_s4 = inlined_call_operand.vmem [shape: bf16[4,32], index: 4, kind: input, shape index: {}]   ;;  %s2343_s5 = inlined_call_operand.vmem [shape: bf16[4,32], index: 5, kind: input, shape index: {}]   ;;  %s2344_s6 = inlined_call_operand.vmem [shape: f32[1,64], index: 6, kind: input, shape index: {}]   ;;  %s2345_s7 = inlined_call_operand.vmem [shape: f32[3,8,32], index: 7, kind: output, shape index: {0}]  }
   0x1   :  { %v1828_v0 = vld.sshfl [vmem:[%s2337_s0] sm:$0x33 pattern:$0x76325410]  ;;  %159 = vmatprep.mubr.bf16.mxu0 %v1774_v1  ;;  %218 = vmatprep.mubr.bf16.mxu1 %v1774_v1  ;;  %v101_v20 = vld [vmem:[%s2338_s2 + $0x4] sm:$0x3]  ;;  %v44_v34 = vunpack.c.l.s4 %v1775_v33  ;;  %v46_v35 = vlaneseq }
   0x2   :  { %v115_v2 = vcombine.high %v1828_v0, %v1828_v0  ;;  %v1837_v3 = vld.sshfl [vmem:[%s2337_s0 + $0x4] sm:$0x33 pattern:$0x76325410]  ;;  %v122_v4 = vsel %vm120_vm0, %v1828_v0, 0  ;;  %vm693_vm9 = vcmask 1042432  }
   0x3   :  { %v176_v5 = vcombine.high %v1837_v3, %v1837_v3  ;;  %v181_v6 = vsel %vm120_vm0, %v1837_v3, 0  ;;  %v99_v7 = vld [vmem:[%s2338_s2] sm:$0x3]  ;;  %v100_v9 = vld [vmem:[%s2338_s2 + $0x2] sm:$0x3]  ;;  %v45_v36 = vunpack.c.0.s8 %v44_v34  ;;  %v47_v37 = vshrl.u32 %v46_v35, 7 }
   0x4   :  { %1654 = vmatprep.subr.msk.bf16.mxu0 %vm120_vm0, %v115_v2  ;;  %v1852_v8 = vld.sshfl [vmem:[%s2337_s0 + $0x8] sm:$0x33 pattern:$0x76325410]  ;;  %v102_v22 = vld [vmem:[%s2338_s2 + $0x6] sm:$0x3] }
   0x5   :  { %1657 = vmatprep.subr.msk.bf16.mxu1 %vm120_vm0, %v176_v5  ;;  %142 = vmatpush1.bf16.msra.mxu0 %v122_v4  ;;  %v235_v10 = vcombine.high %v1852_v8, %v1852_v8  ;;  %v1863_v11 = vld.sshfl [vmem:[%s2337_s0 + $0xc] sm:$0x33 pattern:$0x76325410]  ;;  %v240_v12 = vsel %vm120_vm0, %v1852_v8, 0  ;;  %v48_v39 = vsub.s32 %v45_v36, %v47_v37  ;;  %v1970_v45 = vsub.s32 0, %v47_v37 }
   0x6   :  { %201 = vmatpush1.bf16.msra.mxu1 %v181_v6  ;;  %v294_v13 = vcombine.high %v1863_v11, %v1863_v11  ;;  %v1872_v14 = vld.sshfl [vmem:[%s2337_s0 + $0x10] sm:$0x33 pattern:$0x76325410]  ;;  %v299_v15 = vsel %vm120_vm0, %v1863_v11, 0  ;;  %v1974_v47 = vsub.s32 1, %v47_v37 }
   0x7   :  { %1660 = vmatprep.subr.msk.bf16.mxu0 %vm120_vm0, %v235_v10  ;;  %v1879_v16 = vcombine.high %v1872_v14, %v1872_v14  ;;  %v1884_v17 = vld.sshfl [vmem:[%s2337_s0 + $0x14] sm:$0x33 pattern:$0x76325410]  ;;  %v358_v23 = vsel %vm120_vm0, %v1872_v14, 0 }
   0x8   :  { %1655 = vmatmul.mubr.msk.bf16.vlgmr.msra.gmra.mxu0 %vm116_vm1, %v99_v7  ;;  %1663 = vmatprep.subr.msk.bf16.mxu1 %vm120_vm0, %v294_v13  ;;  %v1890_v18 = vcombine.high %v1884_v17, %v1884_v17  ;;  %v1902_v19 = vld.sshfl [vmem:[%s2337_s0 + $0x18] sm:$0x33 pattern:$0x76325410]  ;;  %v417_v24 = vsel %vm120_vm0, %v1884_v17, 0 }
   0x9   :  { %1658 = vmatmul.mubr.msk.bf16.vlgmr.msra.gmra.mxu1 %vm116_vm1, %v100_v9  ;;  %260 = vmatpush1.bf16.msra.mxu0 %v240_v12  ;;  %v1910_v21 = vld.sshfl [vmem:[%s2337_s0 + $0x1c] sm:$0x33 pattern:$0x76325410]  ;;  %v1921_v25 = vcombine.high %v1902_v19, %v1902_v19  ;;  %v103_v27 = vld [vmem:[%s2338_s2 + $0x8] sm:$0x3] }
   0xa   :  { %319 = vmatpush1.bf16.msra.mxu1 %v299_v15  ;;  %277 = vmatprep.mubr.bf16.mxu0 %v1774_v1  ;;  %v1926_v26 = vcombine.high %v1910_v21, %v1910_v21  ;;  %v104_v28 = vld [vmem:[%s2338_s2 + $0xa] sm:$0x3]  ;;  %v476_v29 = vsel %vm120_vm0, %v1902_v19, 0  ;;  %v535_v30 = vsel %vm120_vm0, %v1910_v21, 0  ;;  %v105_v31 = vld [vmem:[%s2338_s2 + $0xc] sm:$0x3] }
   0xb   :  { %336 = vmatprep.mubr.bf16.mxu1 %v1774_v1  ;;  %1666 = vmatprep.subr.msk.bf16.mxu0 %vm120_vm0, %v1879_v16  ;;  %v106_v32 = vld [vmem:[%s2338_s2 + $0xe] sm:$0x3]  ;;  %v1721_v38 = vld [vmem:[%s2339_s1] ss:$8 sps:$4 sm:$0xff]  }
   0xc   :  { %1669 = vmatprep.subr.msk.bf16.mxu1 %vm120_vm0, %v1890_v18  ;;  %v49_v40 = vrot.slane %v1721_v38, %v48_v39  ;;  %v1723_v44 = vld [vmem:[%s2339_s1 + $0x4] ss:$8 sps:$4 sm:$0xff]  }
   0xd   :  { %v56_v51 = vrot.slane %v1723_v44, %v48_v39 }
   0xe   :  { %v57_v41 = vcombine.high %v49_v40, %v49_v40  ;;  %v1962_v42 = vrot.slane %v49_v40, %v48_v39 }
   0xf   :  { %v58_v56 = vcombine.high %v56_v51, %v56_v51  ;;  %v1993_v60 = vrot.slane %v56_v51, %v48_v39 }
  0x10   :  { %1661 = vmatmul.mubr.msk.bf16.vlgmr.msra.gmra.mxu0 %vm116_vm1, %v101_v20  ;;  %v1964_v43 = vrot.slane %v57_v41, %v48_v39  ;;  %vm581_vm2 = vcmp.gt.f32.partialorder %v1962_v42, 0.0  ;;  %v1978_v48 = vcombine.high %v1962_v42, %v1962_v42 }
  0x11   :  { %1664 = vmatmul.mubr.msk.bf16.vlgmr.msra.gmra.mxu1 %vm116_vm1, %v102_v22  ;;  %378 = vmatpush1.bf16.msra.mxu0 %v358_v23  ;;  %v589_v46 = vsel %vm581_vm2, 1, %v1774_v1  ;;  %v1997_v63 = vrot.slane %v58_v56, %v48_v39  ;;  %vm585_vm11 = vcmp.gt.f32.partialorder %v1993_v60, 0.0 }
  0x12   :  { %437 = vmatpush1.bf16.msra.mxu1 %v417_v24  ;;  %395 = vmatprep.mubr.bf16.mxu0 %v1774_v1  ;;  %vm582_vm3 = vcmp.gt.f32.partialorder %v1964_v43, 0.0  ;;  %v1983_v50 = vcombine.high %v1964_v43, %v1964_v43  ;;  %v600_v52 = vrot.slane %v589_v46, %v1970_v45  ;;  %v604_v54 = vrot.slane %v589_v46, %v1974_v47 }
  0x13   :  { %454 = vmatprep.mubr.bf16.mxu1 %v1774_v1  ;;  %1672 = vmatprep.subr.msk.bf16.mxu0 %vm120_vm0, %v1921_v25  ;;  %v590_v49 = vsel %vm582_vm3, 1, %v1774_v1  ;;  %vm583_vm4 = vcmp.gt.f32.partialorder %v1978_v48, 0.0  ;;  %vm586_vm12 = vcmp.gt.f32.partialorder %v1997_v63, 0.0  ;;  %v2029_v36 = vcombine.high %v1997_v63, %v1997_v63 }
  0x14   :  { %1675 = vmatprep.subr.msk.bf16.mxu1 %vm120_vm0, %v1926_v26  ;;  %v608_v53 = vrot.slane %v590_v49, %v1970_v45  ;;  %v612_v55 = vrot.slane %v590_v49, %v1974_v47  ;;  %vm584_vm5 = vcmp.gt.f32.partialorder %v1983_v50, 0.0  ;;  %vm661_vm6 = vcmp.eq.s32.totalorder %v600_v52, 1 }
  0x15   :  { %v591_v57 = vsel %vm583_vm4, 1, %v1774_v1  ;;  %vm662_vm8 = vcmp.eq.s32.totalorder %v604_v54, 1  ;;  %v592_v59 = vsel %vm584_vm5, 1, %v1774_v1  ;;  %vm588_vm4 = vcmp.gt.f32.partialorder %v2029_v36, 0.0 }
  0x16   :  { %vm663_vm7 = vcmp.eq.s32.totalorder %v608_v53, 1  ;;  %vm664_vm10 = vcmp.eq.s32.totalorder %v612_v55, 1  ;;  %v624_v6 = vrot.slane %v592_v59, %v1970_v45  ;;  %v620_v7 = vrot.slane %v591_v57, %v1974_v47 }
  0x17   :  { %v628_v22 = vrot.slane %v592_v59, %v1974_v47 }
  0x18   :  { %1667 = vmatmul.mubr.msk.bf16.vlgmr.msra.gmra.mxu0 %vm116_vm1, %v103_v27  ;;  %vm667_vm14 = vcmp.eq.s32.totalorder %v624_v6, 1  ;;  %vm666_vm15 = vcmp.eq.s32.totalorder %v620_v7, 1 }
  0x19   :  { %1670 = vmatmul.mubr.msk.bf16.vlgmr.msra.gmra.mxu1 %vm116_vm1, %v104_v28  ;;  %496 = vmatpush1.bf16.msra.mxu0 %v476_v29  ;;  %v593_v29 = vsel %vm585_vm11, 1, %v1774_v1  ;;  %vm668_vm2 = vcmp.eq.s32.totalorder %v628_v22, 1 }
  0x1a   :  { %555 = vmatpush1.bf16.msra.mxu1 %v535_v30  ;;  %513 = vmatprep.mubr.bf16.mxu0 %v1774_v1  ;;  %v632_v38 = vrot.slane %v593_v29, %v1970_v45  ;;  %v636_v46 = vrot.slane %v593_v29, %v1974_v47 }
  0x1b   :  { %572 = vmatprep.mubr.bf16.mxu1 %v1774_v1  ;;  %982 = vmatprep.subr.bf16.mxu0 %v115_v2  ;;  %v616_v2 = vrot.slane %v591_v57, %v1970_v45 }
  0x1c   :  { %1024 = vmatprep.subr.bf16.mxu1 %v176_v5  ;;  %vm669_vm5 = vcmp.eq.s32.totalorder %v632_v38, 1 }
  0x1d   :  { %vm665_vm13 = vcmp.eq.s32.totalorder %v616_v2, 1 }
  0x20   :  { %1673 = vmatmul.mubr.msk.bf16.vlgmr.msra.gmra.mxu0 %vm116_vm1, %v105_v31  ;;  %v594_v31 = vsel %vm586_vm12, 1, %v1774_v1 }
  0x21   :  { %1676 = vmatmul.mubr.msk.bf16.vlgmr.msra.gmra.mxu1 %vm116_vm1, %v106_v32  ;;  %983 = vmatpush1.bf16.xpose.msra.mxu0 %v1828_v0  ;;  %v2023_v32 = vcombine.high %v1993_v60, %v1993_v60  ;;  %v640_v44 = vrot.slane %v594_v31, %v1970_v45  ;;  %v644_v56 = vrot.slane %v594_v31, %v1974_v47 }
  0x22   :  { %1025 = vmatpush1.bf16.xpose.msra.mxu1 %v1837_v3  ;;  %1066 = vmatprep.subr.bf16.mxu0 %v235_v10 }
  0x23   :  { %1108 = vmatprep.subr.bf16.mxu1 %v294_v13  ;;  %vm587_vm3 = vcmp.gt.f32.partialorder %v2023_v32, 0.0 }
  0xc8   :  { %v161_v58 = vpop.f32.mrf.mxu0 }
  0xc9   :  { %v1995_v61 = vsel %vm661_vm6, %v161_v58, -1e+30  ;;  %v220_v62 = vpop.f32.mrf.mxu1  ;;  %vm671_vm6 = vcmp.eq.s32.totalorder %v640_v44, 1 }
  0xca   :  { %v163_v0 = vpop.f32.mrf.mxu0  ;;  %v2000_v3 = vsel %vm663_vm7, %v220_v62, -1e+30  ;;  %v694_v12 = vsel %vm693_vm9, %v1995_v61, -inf  ;;  %vm670_vm7 = vcmp.eq.s32.totalorder %v636_v46, 1 }
  0xcb   :  { %v2002_v4 = vsel %vm662_vm8, %v163_v0, -1e+30  ;;  %v222_v5 = vpop.f32.mrf.mxu1  ;;  %v699_v23 = vsel %vm693_vm9, %v2000_v3, -inf  ;;  %v595_v0 = vsel %vm587_vm3, 1, %v1774_v1  ;;  %vm672_vm8 = vcmp.eq.s32.totalorder %v644_v56, 1 }
  0xcc   :  { %v2006_v9 = vsel %vm664_vm10, %v222_v5, -1e+30  ;;  %v165_v10 = vpop.f32.mrf.mxu0  ;;  %v695_v13 = vsel %vm693_vm9, %v2002_v4, -inf  ;;  %v596_v5 = vsel %vm588_vm4, 1, %v1774_v1  ;;  %vm1344_vm3 = vcmask 1044484  }
  0xcd   :  { %v224_v15 = vpop.f32.mrf.mxu1  ;;  %v696_v20 = vmax.f32 %v694_v12, %v695_v13  ;;  %v700_v24 = vsel %vm693_vm9, %v2006_v9, -inf  ;;  %v656_v1 = vrot.slane %v596_v5, %v1970_v45  ;;  %vm1347_vm4 = vcmask 1045509  }
  0xce   :  { %v166_v27 = vpop.f32.mrf.mxu0  ;;  %v701_v35 = vmax.f32 %v699_v23, %v700_v24 }
  0xcf   :  { %v225_v28 = vpop.f32.mrf.mxu1  ;;  %697 = vmax.xlane.f32.xlu0 %v696_v20  ;;  %v648_v20 = vrot.slane %v595_v0, %v1970_v45  ;;  %vm675_vm11 = vcmp.eq.s32.totalorder %v656_v1, 1 }
  0xd0   :  { %v279_v30 = vpop.f32.mrf.mxu0 }
  0xd1   :  { %v2025_v33 = vsel %vm665_vm13, %v279_v30, -1e+30  ;;  %v338_v34 = vpop.f32.mrf.mxu1  ;;  %v652_v30 = vrot.slane %v595_v0, %v1974_v47  ;;  %vm673_vm10 = vcmp.eq.s32.totalorder %v648_v20, 1 }
  0xd2   :  { %v281_v37 = vpop.f32.mrf.mxu0  ;;  %v2032_v39 = vsel %vm667_vm14, %v338_v34, -1e+30  ;;  %v704_v52 = vsel %vm693_vm9, %v2025_v33, -inf  ;;  %vm1336_vm14 = vcmask 1041409  }
  0xd3   :  { %v2034_v40 = vsel %vm666_vm15, %v281_v37, -1e+30  ;;  %v340_v41 = vpop.f32.mrf.mxu1  ;;  %702 = vmax.xlane.f32.xlu0 %v701_v35  ;;  %v709_v57 = vsel %vm693_vm9, %v2032_v39, -inf  ;;  %v660_v37 = vrot.slane %v596_v5, %v1974_v47  ;;  %vm674_vm12 = vcmp.eq.s32.totalorder %v652_v30, 1 }
  0xd4   :  { %v2038_v49 = vsel %vm668_vm2, %v340_v41, -1e+30  ;;  %v283_v51 = vpop.f32.mrf.mxu0  ;;  %v705_v53 = vsel %vm693_vm9, %v2034_v40, -inf  ;;  %vm1338_vm15 = vcmask 1042434   ;;  %vm1341_vm2 = vcmask 1043459  }
  0xd5   :  { %v342_v54 = vpop.f32.mrf.mxu1  ;;  %v706_v55 = vmax.f32 %v704_v52, %v705_v53  ;;  %v710_v58 = vsel %vm693_vm9, %v2038_v49, -inf  ;;  %vm676_vm13 = vcmp.eq.s32.totalorder %v660_v37, 1 }
  0xd6   :  { %v284_v59 = vpop.f32.mrf.mxu0  ;;  %v711_v10 = vmax.f32 %v709_v57, %v710_v58 }
  0xd7   :  { %v343_v62 = vpop.f32.mrf.mxu1  ;;  %707 = vmax.xlane.f32.xlu1 %v706_v55 }
  0xd8   :  { %v397_v2 = vpop.f32.mrf.mxu0 }
  0xd9   :  { %v2053_v6 = vsel %vm669_vm5, %v397_v2, -1e+30  ;;  %v456_v7 = vpop.f32.mrf.mxu1  ;;  %vm1350_vm5 = vcmask 1046534  }
  0xda   :  { %v714_v12 = vsel %vm693_vm9, %v2053_v6, -inf  ;;  %v2057_v13 = vsel %vm671_vm6, %v456_v7, -1e+30  ;;  %v399_v15 = vpop.f32.mrf.mxu0  ;;  %vm1353_vm6 = vcmask 1047559  }
  0xdb   :  { %v719_v22 = vsel %vm693_vm9, %v2057_v13, -inf  ;;  %v2062_v23 = vsel %vm670_vm7, %v399_v15, -1e+30  ;;  %v458_v24 = vpop.f32.mrf.mxu1  ;;  %712 = vmax.xlane.f32.xlu1 %v711_v10 }
  0xdc   :  { %v715_v27 = vsel %vm693_vm9, %v2062_v23, -inf  ;;  %v2067_v28 = vsel %vm672_vm8, %v458_v24, -1e+30  ;;  %v401_v29 = vpop.f32.mrf.mxu0 }
  0xdd   :  { %v720_v31 = vsel %vm693_vm9, %v2067_v28, -inf  ;;  %v460_v34 = vpop.f32.mrf.mxu1  ;;  %v716_v35 = vmax.f32 %v714_v12, %v715_v27 }
  0xde   :  { %v402_v38 = vpop.f32.mrf.mxu0  ;;  %v721_v41 = vmax.f32 %v719_v22, %v720_v31 }
  0xdf   :  { %v461_v44 = vpop.f32.mrf.mxu1  ;;  %717 = vmax.xlane.f32.xlu0 %v716_v35 }
  0xe0   :  { %722 = vmax.xlane.f32.xlu1 %v721_v41  ;;  %v515_v46 = vpop.f32.mrf.mxu0 }
  0xe1   :  { %v2073_v51 = vsel %vm673_vm10, %v515_v46, -1e+30  ;;  %v574_v52 = vpop.f32.mrf.mxu1 }
  0xe2   :  { %v724_v53 = vsel %vm693_vm9, %v2073_v51, -inf  ;;  %v2077_v54 = vsel %vm675_vm11, %v574_v52, -1e+30  ;;  %v517_v55 = vpop.f32.mrf.mxu0 }
  0xe3   :  { %v729_v56 = vsel %vm693_vm9, %v2077_v54, -inf  ;;  %v2081_v57 = vsel %vm674_vm12, %v517_v55, -1e+30  ;;  %v576_v58 = vpop.f32.mrf.mxu1 }
  0xe4   :  { %v725_v59 = vsel %vm693_vm9, %v2081_v57, -inf  ;;  %v2085_v62 = vsel %vm676_vm13, %v576_v58, -1e+30  ;;  %v519_v0 = vpop.f32.mrf.mxu0 }
  0xe5   :  { %v730_v2 = vsel %vm693_vm9, %v2085_v62, -inf  ;;  %v578_v5 = vpop.f32.mrf.mxu1  ;;  %v726_v7 = vmax.f32 %v724_v53, %v725_v59  ;;  %v785_v53 = vrot.slane %v1962_v42, %v1970_v45 }
  0xe6   :  { %v520_v10 = vpop.f32.mrf.mxu0  ;;  %v731_v12 = vmax.f32 %v729_v56, %v730_v2 }
  0xe7   :  { %v579_v15 = vpop.f32.mrf.mxu1  ;;  %727 = vmax.xlane.f32.xlu0 %v726_v7  ;;  %v793_v7 = vrot.slane %v1964_v43, %v1970_v45 }
  0xe8   :  { %732 = vmax.xlane.f32.xlu1 %v731_v12 }
 0x158   :  { %v698_v20 = vpop.xlane.xlu0 %697 }
 0x159   :  { %v734_v22 = vsub.f32 %v1995_v61, %v698_v20  ;;  %v735_v24 = vsub.f32 %v2002_v4, %v698_v20 }
 0x15b   :  { %v750_v1 = vmul.f32 1.442695, %v734_v22  ;;  %v752_v27 = vmul.f32 1.442695, %v735_v24 }
 0x15c   :  { %v703_v29 = vpop.xlane.xlu0 %702 }
 0x15d   :  { %1724 = vpow2.f32 %v750_v1  ;;  %v736_v30 = vsub.f32 %v2000_v3, %v703_v29  ;;  %v737_v31 = vsub.f32 %v2006_v9, %v703_v29  ;;  %v805_v29 = vrot.slane %v1978_v48, %v1974_v47 }
 0x15e   :  { %1726 = vpow2.f32 %v752_v27 }
 0x15f   :  { %v754_v34 = vmul.f32 1.442695, %v736_v30  ;;  %v756_v35 = vmul.f32 1.442695, %v737_v31 }
 0x160   :  { %v708_v37 = vpop.xlane.xlu1 %707 }
 0x161   :  { %1728 = vpow2.f32 %v754_v34  ;;  %v738_v38 = vsub.f32 %v2025_v33, %v708_v37  ;;  %v739_v41 = vsub.f32 %v2034_v40, %v708_v37  ;;  %v789_v33 = vrot.slane %v1962_v42, %v1974_v47 }
 0x162   :  { %1730 = vpow2.f32 %v756_v35  ;;  %v797_v42 = vrot.slane %v1964_v43, %v1974_v47  ;;  %v801_v43 = vrot.slane %v1978_v48, %v1970_v45  ;;  %v809_v48 = vrot.slane %v1983_v50, %v1970_v45 }
 0x163   :  { %v758_v61 = vmul.f32 1.442695, %v738_v38  ;;  %v760_v4 = vmul.f32 1.442695, %v739_v41 }
 0x164   :  { %v713_v44 = vpop.xlane.xlu1 %712 }
 0x165   :  { %1732 = vpow2.f32 %v758_v61  ;;  %v740_v46 = vsub.f32 %v2032_v39, %v713_v44  ;;  %v741_v3 = vsub.f32 %v2038_v49, %v713_v44 }
 0x166   :  { %1734 = vpow2.f32 %v760_v4 }
 0x167   :  { %v762_v9 = vmul.f32 1.442695, %v740_v46  ;;  %v764_v52 = vmul.f32 1.442695, %v741_v3 }
 0x168   :  { %v718_v55 = vpop.xlane.xlu0 %717 }
 0x169   :  { %1736 = vpow2.f32 %v762_v9  ;;  %v723_v40 = vpop.xlane.xlu1 %722  ;;  %v742_v56 = vsub.f32 %v2053_v6, %v718_v55  ;;  %v743_v58 = vsub.f32 %v2062_v23, %v718_v55 }
 0x16a   :  { %v1725_v59 = vpop.eup %1724  ;;  %1738 = vpow2.f32 %v764_v52  ;;  %v744_v39 = vsub.f32 %v2057_v13, %v723_v40  ;;  %v745_v49 = vsub.f32 %v2067_v28, %v723_v40 }
 0x16b   :  { %v1727_v0 = vpop.eup %1726  ;;  %v766_v2 = vmul.f32 1.442695, %v742_v56  ;;  %v2105_v5 = vmul.f32 %v1725_v59, %v785_v53  ;;  %v768_v12 = vmul.f32 1.442695, %v743_v58  ;;  %v825_v59 = vrot.slane %v1997_v63, %v1970_v45 }
 0x16c   :  { %v770_v10 = vmul.f32 1.442695, %v744_v39  ;;  %v772_v6 = vmul.f32 1.442695, %v745_v49  ;;  %v2111_v23 = vmul.f32 %v1727_v0, %v789_v33  ;;  %v829_v49 = vrot.slane %v1997_v63, %v1974_v47 }
 0x16d   :  { %1740 = vpow2.f32 %v766_v2  ;;  %v878_v13 = vsel %vm693_vm9, %v2105_v5, 0.0 }
 0x16e   :  { %v1729_v28 = vpop.eup %1728  ;;  %1742 = vpow2.f32 %v770_v10  ;;  %v879_v15 = vsel %vm693_vm9, %v2111_v23, 0.0 }
 0x16f   :  { %v1731_v20 = vpop.eup %1730  ;;  %1744 = vpow2.f32 %v772_v6  ;;  %v880_v22 = vadd.f32 %v879_v15, %v878_v13  ;;  %v2117_v24 = vmul.f32 %v1729_v28, %v793_v7  ;;  %v821_v7 = vrot.slane %v1993_v60, %v1974_v47 }
 0x170   :  { %1746 = vpow2.f32 %v768_v12  ;;  %v728_v1 = vpop.xlane.xlu0 %727  ;;  %v2121_v27 = vmul.f32 %v1731_v20, %v797_v42 }
 0x171   :  { %v733_v30 = vpop.xlane.xlu1 %732  ;;  %881 = vadd.xlane.f32.xlu0 %v880_v22  ;;  %v746_v31 = vsub.f32 %v2073_v51, %v728_v1  ;;  %v747_v34 = vsub.f32 %v2081_v57, %v728_v1  ;;  %v883_v35 = vsel %vm693_vm9, %v2117_v24, 0.0  ;;  %v813_v57 = vrot.slane %v1983_v50, %v1974_v47 }
 0x172   :  { %v1733_v37 = vpop.eup %1732  ;;  %v748_v38 = vsub.f32 %v2077_v54, %v733_v30  ;;  %v749_v41 = vsub.f32 %v2085_v62, %v733_v30  ;;  %v884_v61 = vsel %vm693_vm9, %v2121_v27, 0.0  ;;  %v817_v50 = vrot.slane %v1993_v60, %v1970_v45 }
 0x173   :  { %v1735_v4 = vpop.eup %1734  ;;  %v774_v44 = vmul.f32 1.442695, %v746_v31  ;;  %v885_v46 = vadd.f32 %v884_v61, %v883_v35  ;;  %v2135_v51 = vmul.f32 %v1733_v37, %v801_v43  ;;  %v776_v52 = vmul.f32 1.442695, %v747_v34 }
 0x174   :  { %v778_v3 = vmul.f32 1.442695, %v748_v38  ;;  %v780_v9 = vmul.f32 1.442695, %v749_v41  ;;  %v2139_v54 = vmul.f32 %v1735_v4, %v805_v29  ;;  %v833_v43 = vrot.slane %v2023_v32, %v1970_v45 }
 0x175   :  { %1748 = vpow2.f32 %v774_v44  ;;  %886 = vadd.xlane.f32.xlu1 %v885_v46  ;;  %v888_v62 = vsel %vm693_vm9, %v2135_v51, 0.0  ;;  %v841_v30 = vrot.slane %v2029_v36, %v1970_v45  ;;  %v845_v34 = vrot.slane %v2029_v36, %v1974_v47 }
 0x176   :  { %v1737_v53 = vpop.eup %1736  ;;  %1750 = vpow2.f32 %v778_v3  ;;  %v889_v55 = vsel %vm693_vm9, %v2139_v54, 0.0  ;;  %v837_v37 = vrot.slane %v2023_v32, %v1974_v47 }
 0x177   :  { %v1739_v33 = vpop.eup %1738  ;;  %1752 = vpow2.f32 %v780_v9  ;;  %v890_v40 = vadd.f32 %v889_v55, %v888_v62  ;;  %v2145_v56 = vmul.f32 %v1737_v53, %v809_v48 }
 0x178   :  { %1754 = vpow2.f32 %v776_v52  ;;  %v2149_v58 = vmul.f32 %v1739_v33, %v813_v57 }
 0x179   :  { %891 = vadd.xlane.f32.xlu0 %v890_v40  ;;  %v893_v39 = vsel %vm693_vm9, %v2145_v56, 0.0 }
 0x17a   :  { %v1741_v0 = vpop.eup %1740  ;;  %v894_v2 = vsel %vm693_vm9, %v2149_v58, 0.0 }
 0x17b   :  { %v1743_v42 = vpop.eup %1742  ;;  %v895_v10 = vadd.f32 %v894_v2, %v893_v39  ;;  %v2161_v6 = vmul.f32 %v1741_v0, %v817_v50 }
 0x17c   :  { %v1745_v12 = vpop.eup %1744  ;;  %v2163_v13 = vmul.f32 %v1743_v42, %v825_v59 }
 0x17d   :  { %v1747_v28 = vpop.eup %1746  ;;  %896 = vadd.xlane.f32.xlu1 %v895_v10  ;;  %v2165_v15 = vmul.f32 %v1745_v12, %v829_v49  ;;  %v898_v22 = vsel %vm693_vm9, %v2161_v6, 0.0 }
 0x17e   :  { %v903_v63 = vsel %vm693_vm9, %v2163_v13, 0.0  ;;  %v2169_v20 = vmul.f32 %v1747_v28, %v821_v7 }
 0x17f   :  { %v904_v60 = vsel %vm693_vm9, %v2165_v15, 0.0 }
 0x180   :  { %v905_v1 = vadd.f32 %v904_v60, %v903_v63  ;;  %v899_v29 = vsel %vm693_vm9, %v2169_v20, 0.0 }
 0x181   :  { %v900_v31 = vadd.f32 %v899_v29, %v898_v22 }
 0x182   :  { %v1749_v35 = vpop.eup %1748  ;;  %906 = vadd.xlane.f32.xlu1 %v905_v1 }
 0x183   :  { %v1751_v38 = vpop.eup %1750  ;;  %901 = vadd.xlane.f32.xlu0 %v900_v31  ;;  %v2185_v41 = vmul.f32 %v1749_v35, %v833_v43 }
 0x184   :  { %v1753_v61 = vpop.eup %1752  ;;  %v2187_v48 = vmul.f32 %v1751_v38, %v841_v30 }
 0x185   :  { %v1755_v4 = vpop.eup %1754  ;;  %v2189_v44 = vmul.f32 %v1753_v61, %v845_v34  ;;  %v908_v36 = vsel %vm693_vm9, %v2185_v41, 0.0 }
 0x186   :  { %v913_v45 = vsel %vm693_vm9, %v2187_v48, 0.0  ;;  %v2193_v46 = vmul.f32 %v1755_v4, %v837_v37 }
 0x187   :  { %v914_v47 = vsel %vm693_vm9, %v2189_v44, 0.0 }
 0x188   :  { %v915_v32 = vadd.f32 %v914_v47, %v913_v45  ;;  %v909_v57 = vsel %vm693_vm9, %v2193_v46, 0.0  ;;  %vm1777_vm9 = vmmov 0  }
 0x189   :  { %v910_v3 = vadd.f32 %v909_v57, %v908_v36 }
 0x18a   :  { %916 = vadd.xlane.f32.xlu1 %v915_v32 }
 0x18b   :  { %911 = vadd.xlane.f32.xlu0 %v910_v3 }
 0x1fa   :  { %v882_v9 = vpop.xlane.xlu0 %881 }
 0x1fb   :  { %v918_v52 = vmax.f32 %v882_v9, 1e-30 }
 0x1fd   :  { %1756 = vrcp.f32 %v918_v52 }
 0x1fe   :  { %v887_v62 = vpop.xlane.xlu1 %886 }
 0x1ff   :  { %v919_v53 = vmax.f32 %v887_v62, 1e-30 }
 0x201   :  { %1758 = vrcp.f32 %v919_v53 }
 0x202   :  { %v892_v55 = vpop.xlane.xlu0 %891 }
 0x203   :  { %v920_v33 = vmax.f32 %v892_v55, 1e-30 }
 0x205   :  { %1760 = vrcp.f32 %v920_v33 }
 0x206   :  { %v897_v40 = vpop.xlane.xlu1 %896 }
 0x207   :  { %v921_v50 = vmax.f32 %v897_v40, 1e-30 }
 0x209   :  { %1762 = vrcp.f32 %v921_v50 }
 0x20a   :  { %v1757_v59 = vpop.eup %1756 }
 0x20b   :  { %v907_v39 = vpop.xlane.xlu1 %906  ;;  %v927_v49 = vmul.f32 %v1757_v59, %v2105_v5  ;;  %v928_v0 = vmul.f32 %v1757_v59, %v2111_v23 }
 0x20c   :  { %v923_v2 = vmax.f32 %v907_v39, 1e-30  ;;  %v902_v7 = vpop.xlane.xlu0 %901 }
 0x20d   :  { %v922_v42 = vmax.f32 %v902_v7, 1e-30  ;;  %v951_v10 = vpack.c.bf16 %v928_v0, %v928_v0  ;;  %v1565_v12 = vcombine.low %v927_v49, %v928_v0  ;;  %v950_v28 = vpack.c.bf16 %v927_v49, %v927_v49 }
 0x20e   :  { %v1759_v63 = vpop.eup %1758  ;;  %1764 = vrcp.f32 %v923_v2 }
 0x20f   :  { %1766 = vrcp.f32 %v922_v42  ;;  %1000 = vmatprep.mubr.bf16.mxu0 %v951_v10  ;;  %1683 = vst.sshfl [vmem:[%s2340_s8] sm:$0x33 pattern:$0x76325410] %v1565_v12  ;;  %v930_v22 = vmul.f32 %v1759_v63, %v2117_v24  ;;  %v931_v5 = vmul.f32 %v1759_v63, %v2121_v27 }
 0x210   :  { %1001 = vmatmul.mubr.bf16.vlgmr.msra.gmra.mxu0 %v950_v28 }
 0x211   :  { %1067 = vmatpush1.bf16.xpose.msra.mxu0 %v1852_v8  ;;  %v953_v23 = vpack.c.bf16 %v931_v5, %v931_v5  ;;  %v1573_v60 = vcombine.low %v930_v22, %v931_v5  ;;  %v952_v43 = vpack.c.bf16 %v930_v22, %v930_v22 }
 0x212   :  { %v1761_v1 = vpop.eup %1760  ;;  %1150 = vmatprep.subr.bf16.mxu0 %v1879_v16 }
 0x213   :  { %v917_v29 = vpop.xlane.xlu1 %916  ;;  %1042 = vmatprep.mubr.bf16.mxu1 %v953_v23  ;;  %1684 = vst.sshfl [vmem:[%s2340_s8 + $0x4] sm:$0x33 pattern:$0x76325410] %v1573_v60  ;;  %v933_v30 = vmul.f32 %v1761_v1, %v2135_v51  ;;  %v934_v24 = vmul.f32 %v1761_v1, %v2139_v54 }
 0x214   :  { %v925_v27 = vmax.f32 %v917_v29, 1e-30  ;;  %v912_v31 = vpop.xlane.xlu0 %911  ;;  %1043 = vmatmul.mubr.bf16.vlgmr.msra.gmra.mxu1 %v952_v43 }
 0x215   :  { %v924_v8 = vmax.f32 %v912_v31, 1e-30  ;;  %1109 = vmatpush1.bf16.xpose.msra.mxu1 %v1863_v11  ;;  %v955_v34 = vpack.c.bf16 %v934_v24, %v934_v24  ;;  %v1581_v35 = vcombine.low %v933_v30, %v934_v24  ;;  %v954_v37 = vpack.c.bf16 %v933_v30, %v933_v30 }
 0x216   :  { %v1763_v16 = vpop.eup %1762  ;;  %1768 = vrcp.f32 %v925_v27  ;;  %1192 = vmatprep.subr.bf16.mxu1 %v1890_v18 }
 0x217   :  { %1770 = vrcp.f32 %v924_v8  ;;  %1084 = vmatprep.mubr.bf16.mxu0 %v955_v34  ;;  %1685 = vst.sshfl [vmem:[%s2340_s8 + $0x8] sm:$0x33 pattern:$0x76325410] %v1581_v35  ;;  %v936_v51 = vmul.f32 %v1763_v16, %v2145_v56  ;;  %v937_v54 = vmul.f32 %v1763_v16, %v2149_v58 }
 0x218   :  { %1085 = vmatmul.mubr.bf16.vlgmr.msra.gmra.mxu0 %v954_v37 }
 0x219   :  { %1151 = vmatpush1.bf16.xpose.msra.mxu0 %v1872_v14  ;;  %v957_v11 = vpack.c.bf16 %v937_v54, %v937_v54  ;;  %v1589_v38 = vcombine.low %v936_v51, %v937_v54  ;;  %v956_v61 = vpack.c.bf16 %v936_v51, %v936_v51 }
 0x21a   :  { %1234 = vmatprep.subr.bf16.mxu0 %v1921_v25 }
 0x21b   :  { %v1765_v4 = vpop.eup %1764  ;;  %1126 = vmatprep.mubr.bf16.mxu1 %v957_v11  ;;  %1686 = vst.sshfl [vmem:[%s2340_s8 + $0xc] sm:$0x33 pattern:$0x76325410] %v1589_v38 }
 0x21c   :  { %v1767_v18 = vpop.eup %1766  ;;  %1127 = vmatmul.mubr.bf16.vlgmr.msra.gmra.mxu1 %v956_v61  ;;  %v942_v56 = vmul.f32 %v1765_v4, %v2163_v13  ;;  %v943_v58 = vmul.f32 %v1765_v4, %v2165_v15 }
 0x21d   :  { %1193 = vmatpush1.bf16.xpose.msra.mxu1 %v1884_v17  ;;  %v939_v14 = vmul.f32 %v1767_v18, %v2161_v6  ;;  %v940_v45 = vmul.f32 %v1767_v18, %v2169_v20 }
 0x21e   :  { %v961_v36 = vpack.c.bf16 %v943_v58, %v943_v58  ;;  %v1605_v25 = vcombine.low %v942_v56, %v943_v58  ;;  %1276 = vmatprep.subr.bf16.mxu1 %v1926_v26  ;;  %v960_v17 = vpack.c.bf16 %v942_v56, %v942_v56 }
 0x21f   :  { %v959_v47 = vpack.c.bf16 %v940_v45, %v940_v45  ;;  %v1597_v32 = vcombine.low %v939_v14, %v940_v45  ;;  %v958_v57 = vpack.c.bf16 %v939_v14, %v939_v14 }
 0x220   :  { %1210 = vmatprep.mubr.bf16.mxu1 %v961_v36  ;;  %1688 = vst.sshfl [vmem:[%s2340_s8 + $0x14] sm:$0x33 pattern:$0x76325410] %v1605_v25 }
 0x221   :  { %1168 = vmatprep.mubr.bf16.mxu0 %v959_v47  ;;  %1687 = vst.sshfl [vmem:[%s2340_s8 + $0x10] sm:$0x33 pattern:$0x76325410] %v1597_v32  ;;  %v1464_v32 = vld [vmem:[%s2343_s5] sm:$0x3] }
 0x222   :  { %1169 = vmatmul.mubr.bf16.vlgmr.msra.gmra.mxu0 %v958_v57 }
 0x223   :  { %v1769_v6 = vpop.eup %1768  ;;  %1235 = vmatpush1.bf16.xpose.msra.mxu0 %v1902_v19 }
 0x224   :  { %v1771_v13 = vpop.eup %1770  ;;  %1211 = vmatmul.mubr.bf16.vlgmr.msra.gmra.mxu1 %v960_v17  ;;  %v948_v26 = vmul.f32 %v1769_v6, %v2187_v48  ;;  %v949_v15 = vmul.f32 %v1769_v6, %v2189_v44  ;;  %v1776_v48 = vmov 0.0  }
 0x225   :  { %1277 = vmatpush1.bf16.xpose.msra.mxu1 %v1910_v21  ;;  %v945_v20 = vmul.f32 %v1771_v13, %v2185_v41  ;;  %v946_v3 = vmul.f32 %v1771_v13, %v2193_v46  ;;  %v1310_v21 = vld [vmem:[%s2341_s3] sm:$0x3]  ;;  %1697 = vmatprep.subr.bf16.mxu0 %v1776_v48 }
 0x226   :  { %v965_v9 = vpack.c.bf16 %v949_v15, %v949_v15  ;;  %v1621_v52 = vcombine.low %v948_v26, %v949_v15  ;;  %v964_v19 = vpack.c.bf16 %v948_v26, %v948_v26  ;;  %v1402_v41 = vld [vmem:[%s2342_s4] sm:$0x3]  ;;  %v1360_v44 = vsel %vm120_vm0, %v1310_v21, 0  ;;  %1703 = vmatprep.subr.bf16.mxu1 %v1776_v48 }
 0x227   :  { %v963_v62 = vpack.c.bf16 %v946_v3, %v946_v3  ;;  %v1613_v53 = vcombine.low %v945_v20, %v946_v3  ;;  %v962_v55 = vpack.c.bf16 %v945_v20, %v945_v20  ;;  %v1422_v46 = vsel %vm120_vm0, %v1402_v41, 0 }
 0x228   :  { %1294 = vmatprep.mubr.bf16.mxu1 %v965_v9  ;;  %1690 = vst.sshfl [vmem:[%s2340_s8 + $0x1c] sm:$0x33 pattern:$0x76325410] %v1621_v52  ;;  %v1484_v21 = vsel %vm120_vm0, %v1464_v32, 0  ;;  %vm1528_vm0 = vcmask 261120  }
 0x229   :  { %1252 = vmatprep.mubr.bf16.mxu0 %v963_v62  ;;  %1689 = vst.sshfl [vmem:[%s2340_s8 + $0x18] sm:$0x33 pattern:$0x76325410] %v1613_v53 }
 0x22a   :  { %1253 = vmatmul.mubr.bf16.vlgmr.msra.gmra.mxu0 %v962_v55 }
 0x22b   :  { %1698 = vmatpush3.bf16.msra.mxu0 %v1360_v44  ;;  %1699 = vmatprep.mubr.msk.bf16.mxu0 %vm1777_vm9, %v1776_v48 }
 0x22c   :  { %1295 = vmatmul.mubr.bf16.vlgmr.msra.gmra.mxu1 %v964_v19  ;;  %1709 = vmatprep.subr.bf16.mxu0 %v1776_v48 }
 0x22d   :  { %1704 = vmatpush3.bf16.msra.mxu1 %v1422_v46  ;;  %1705 = vmatprep.mubr.msk.bf16.mxu1 %vm1777_vm9, %v1776_v48 }
 0x2d0   :  { %v1002_v33 = vpop.f32.mrf.mxu0 }
 0x2d1   :  { %v1302_v23 = vpack.c.bf16 %v1002_v33, %v1002_v33 }
 0x2d2   :  { %v1004_v40 = vpop.f32.mrf.mxu0 }
 0x2d3   :  { %v2268_v8 = vunpack.c.l.b16 %v1302_v23 }
 0x2d4   :  { %v1005_v50 = vpop.f32.mrf.mxu0  ;;  %v1044_v59 = vpop.f32.mrf.mxu1 }
 0x2d5   :  { %v1303_v22 = vpack.c.bf16 %v1044_v59, %v1044_v59  ;;  %v1334_v18 = vrot.slane %v2268_v8, 2  ;;  %v1465_v40 = vrot.slane %v2268_v8, 1 }
 0x2d6   :  { %v1006_v39 = vpop.f32.mrf.mxu0  ;;  %v1046_v49 = vpop.f32.mrf.mxu1 }
 0x2d7   :  { %v2266_v29 = vunpack.c.l.b16 %v1303_v22 }
 0x2d8   :  { %v1047_v0 = vpop.f32.mrf.mxu1  ;;  %v1086_v2 = vpop.f32.mrf.mxu0 }
 0x2d9   :  { %v1304_v60 = vpack.c.bf16 %v1086_v2, %v1086_v2  ;;  %v1335_v51 = vrot.slane %v2266_v29, 1  ;;  %v1403_v11 = vrot.slane %v2266_v29, 7  ;;  %v1466_v23 = vsel %vm1336_vm14, %v2266_v29, %v1465_v40 }
 0x2da   :  { %v1048_v7 = vpop.f32.mrf.mxu1  ;;  %v1088_v42 = vpop.f32.mrf.mxu0 }
 0x2db   :  { %v2270_v35 = vunpack.c.l.b16 %v1304_v60  ;;  %v1337_v36 = vsel %vm1336_vm14, %v1335_v51, %v1334_v18  ;;  %v1404_v57 = vsel %vm1336_vm14, %v1403_v11, %v2268_v8  ;;  %v1677_v11 = vld [vmem:[%s2344_s6] ss:$0 sm:$0xff]  ;;  %s1778_s6 = smov 32  }
 0x2dc   :  { %v1089_v10 = vpop.f32.mrf.mxu0  ;;  %v1128_v12 = vpop.f32.mrf.mxu1 }
 0x2dd   :  { %v1305_v30 = vpack.c.bf16 %v1128_v12, %v1128_v12  ;;  %v1405_v58 = vrot.slane %v2270_v35, 6  ;;  %v1339_v52 = vsel %vm1338_vm15, %v2270_v35, %v1337_v36  ;;  %v1467_v50 = vrot.slane %v2270_v35, 7 }
 0x2de   :  { %v1090_v28 = vpop.f32.mrf.mxu0  ;;  %v1130_v63 = vpop.f32.mrf.mxu1 }
 0x2df   :  { %v2273_v54 = vunpack.c.l.b16 %v1305_v30  ;;  %v1406_v62 = vsel %vm1338_vm15, %v1405_v58, %v1404_v57  ;;  %v1468_v30 = vsel %vm1338_vm15, %v1467_v50, %v1466_v23 }
 0x2e0   :  { %v1131_v5 = vpop.f32.mrf.mxu1 }
 0x2e1   :  { %v1340_v25 = vrot.slane %v2273_v54, 7  ;;  %v1407_v17 = vrot.slane %v2273_v54, 5  ;;  %v1469_v2 = vrot.slane %v2273_v54, 6 }
 0x2e2   :  { %v1170_v43 = vpop.f32.mrf.mxu0  ;;  %v1132_v1 = vpop.f32.mrf.mxu1 }
 0x2e3   :  { %v1306_v24 = vpack.c.bf16 %v1170_v43, %v1170_v43  ;;  %v1342_v41 = vsel %vm1341_vm2, %v1340_v25, %v1339_v52  ;;  %v1408_v59 = vsel %vm1341_vm2, %v1407_v17, %v1406_v62  ;;  %v1470_v8 = vsel %vm1341_vm2, %v1469_v2, %v1468_v30 }
 0x2e4   :  { %v1172_v27 = vpop.f32.mrf.mxu0  ;;  %v1212_v31 = vpop.f32.mrf.mxu1 }
 0x2e5   :  { %v1307_v34 = vpack.c.bf16 %v1212_v31, %v1212_v31  ;;  %v2276_v38 = vunpack.c.l.b16 %v1306_v24 }
 0x2e6   :  { %v1173_v37 = vpop.f32.mrf.mxu0  ;;  %v1214_v16 = vpop.f32.mrf.mxu1 }
 0x2e7   :  { %v1331_v56 = vunpack.c.l.b16 %v1307_v34  ;;  %v1343_v6 = vrot.slane %v2276_v38, 6  ;;  %v1409_v15 = vrot.slane %v2276_v38, 4  ;;  %v1471_v12 = vrot.slane %v2276_v38, 5 }
 0x2e8   :  { %v1174_v61 = vpop.f32.mrf.mxu0  ;;  %v1215_v4 = vpop.f32.mrf.mxu1 }
 0x2e9   :  { %v1346_v20 = vrot.slane %v1331_v56, 5  ;;  %v1411_v53 = vrot.slane %v1331_v56, 3  ;;  %v1345_v39 = vsel %vm1344_vm3, %v1343_v6, %v1342_v41  ;;  %v1410_v7 = vsel %vm1344_vm3, %v1409_v15, %v1408_v59 }
 0x2ea   :  { %v1254_v14 = vpop.f32.mrf.mxu0  ;;  %v1216_v45 = vpop.f32.mrf.mxu1  ;;  %v1473_v60 = vrot.slane %v1331_v56, 4  ;;  %v1472_v37 = vsel %vm1344_vm3, %v1471_v12, %v1470_v8 }
 0x2eb   :  { %v1308_v47 = vpack.c.bf16 %v1254_v14, %v1254_v14  ;;  %v1348_v42 = vsel %vm1347_vm4, %v1346_v20, %v1345_v39  ;;  %v1412_v28 = vsel %vm1347_vm4, %v1411_v53, %v1410_v7 }
 0x2ec   :  { %v1256_v13 = vpop.f32.mrf.mxu0  ;;  %v1296_v26 = vpop.f32.mrf.mxu1  ;;  %v1474_v29 = vsel %vm1347_vm4, %v1473_v60, %v1472_v37 }
 0x2ed   :  { %v1332_v3 = vunpack.c.l.b16 %v1308_v47  ;;  %v1309_v9 = vpack.c.bf16 %v1296_v26, %v1296_v26 }
 0x2ee   :  { %v1257_v55 = vpop.f32.mrf.mxu0  ;;  %v1298_v19 = vpop.f32.mrf.mxu1 }
 0x2ef   :  { %v1349_v44 = vrot.slane %v1332_v3, 4  ;;  %v1413_v46 = vrot.slane %v1332_v3, 2  ;;  %v1333_v33 = vunpack.c.l.b16 %v1309_v9  ;;  %v1475_v24 = vrot.slane %v1332_v3, 3 }
 0x2f0   :  { %v1258_v49 = vpop.f32.mrf.mxu0  ;;  %v1299_v0 = vpop.f32.mrf.mxu1 }
 0x2f1   :  { %v1352_v10 = vrot.slane %v1333_v33, 3  ;;  %v1351_v63 = vsel %vm1350_vm5, %v1349_v44, %v1348_v42  ;;  %v1415_v22 = vrot.slane %v1333_v33, 1  ;;  %v1414_v43 = vsel %vm1350_vm5, %v1413_v46, %v1412_v28 }
 0x2f2   :  { %v1300_v5 = vpop.f32.mrf.mxu1  ;;  %v1477_v35 = vrot.slane %v1333_v33, 2  ;;  %v1476_v16 = vsel %vm1350_vm5, %v1475_v24, %v1474_v29 }
 0x2f3   :  { %v1354_v1 = vsel %vm1353_vm6, %v1352_v10, %v1351_v63  ;;  %v1416_v31 = vsel %vm1353_vm6, %v1415_v22, %v1414_v43 }
 0x2f4   :  { %v1355_v27 = vpack.c.b16 %v1354_v1, %v1354_v1  ;;  %v1417_v34 = vpack.c.b16 %v1416_v31, %v1416_v31  ;;  %v1478_v51 = vsel %vm1353_vm6, %v1477_v35, %v1476_v16 }
 0x2f5   :  { %v1479_v54 = vpack.c.b16 %v1478_v51, %v1478_v51 }
 0x2f6   :  { %1700 = vmatmul.mubr.msk.bf16.vlgmr.msra.gmra.mxu0 %vm116_vm1, %v1355_v27  ;;  %1706 = vmatmul.mubr.msk.bf16.vlgmr.msra.gmra.mxu1 %vm116_vm1, %v1417_v34 }
 0x2f7   :  { %1710 = vmatpush3.bf16.msra.mxu0 %v1484_v21  ;;  %1711 = vmatprep.mubr.msk.bf16.mxu0 %vm1777_vm9, %v1776_v48 }
 0x2fe   :  { %1712 = vmatmul.mubr.msk.bf16.vlgmr.msra.gmra.mxu0 %vm116_vm1, %v1479_v54 }
 0x3b6   :  { %v1396_v38 = vpop.f32.mrf.mxu0  ;;  %v1458_v4 = vpop.f32.mrf.mxu1 }
 0x3b7   :  { %v1397_v61 = vadd.f32 %v1677_v11, %v1396_v38  ;;  %1681 = vst.msk [vmem:[%s2345_s7 + $0x8] sm:$0xff] %vm1528_vm0, %v1458_v4 }
 0x3b8   :  { %v1701_v18 = vpop.f32.mrf.mxu0  ;;  %v1707_v56 = vpop.f32.mrf.mxu1 }
 0x3b9   :  { %v1526_v48 = vadd.f32 %v1458_v4, %v1397_v61 }
 0x3ba   :  { %v1399_v58 = vpop.f32.mrf.mxu0  ;;  %v1461_v14 = vpop.f32.mrf.mxu1 }
 0x3bb   :  { %v1527_v45 = vmul.f32 %v1526_v48, %v1526_v48 }
 0x3bc   :  { %v1702_v36 = vpop.f32.mrf.mxu0  ;;  %v1708_v25 = vpop.f32.mrf.mxu1 }
 0x3bd   :  { %v1529_v47 = vsel %vm1528_vm0, %v1527_v45, 0.0 }
 0x3be   :  { %1530 = vadd.xlane.f32.xlu1 %v1529_v47  ;;  %v1520_v32 = vpop.f32.mrf.mxu0 }
 0x3bf   :  { %1536 = vrot.lane.b32.xlu0 %v1520_v32, %s1778_s6 }
 0x3c0   :  { %v1713_v57 = vpop.f32.mrf.mxu0 }
 0x3c2   :  { %v1523_v17 = vpop.f32.mrf.mxu0 }
 0x3c4   :  { %v1714_v6 = vpop.f32.mrf.mxu0 }
 0x431   :  { %v1537_v13 = vpop.permute.xlu0 %1536 }
 0x432   :  { %v1539_v26 = vadd.f32 %v1537_v13, %v1397_v61 }
 0x434   :  { %1544 = vrot.lane.b32.xlu1 %v1539_v26, %s1779_s15 }
 0x447   :  { %v1531_v15 = vpop.xlane.xlu1 %1530 }
 0x448   :  { %v1532_v20 = vadd.f32 1e-12, %v1531_v15 }
 0x44a   :  { %1772 = vrsqrt.f32 %v1532_v20 }
 0x457   :  { %v1773_v3 = vpop.eup %1772 }
 0x458   :  { %v1534_v9 = vmul.f32 %v1773_v3, %v1526_v48 }
 0x45a   :  { %1540 = vst.msk [vmem:[%s2345_s7] sm:$0xff] %vm1528_vm0, %v1534_v9 }
 0x4a6   :  { %v1545_v52 = vpop.permute.xlu1 %1544 }
 0x4a7   :  { %1682 = vst.msk [vmem:[%s2345_s7 + $0x10] sm:$0xff] %vm1528_vm0, %v1545_v52 }

// kernel: pcme_forward.3
= control target key start
LH: loop header
LB: loop body
LE: loop exit
PB: predicated region body
PF: predicated region fallthrough
CT: control target
= control target key end

     0   :  { %v1604_v0 = vmov 0.0   ;;  %vm1605_vm0 = vmmov 0   ;;  %vm118_vm1 = vcmask 130048   ;;  %v1606_v17 = vmov 1966171168   ;;  %s1609_s13 = smov 96   ;;  %s2050_s0 = inlined_call_operand.vmem [shape: bf16[8,16,8], index: 0, kind: input, shape index: {}]   ;;  %s2051_s2 = inlined_call_operand.vmem [shape: bf16[8,3,16], index: 2, kind: input, shape index: {}]   ;;  %s2052_s1 = inlined_call_operand.vmem [shape: f32[8,8], index: 1, kind: input, shape index: {}]   ;;  %s2053_s8 = inlined_call_operand.vmem [shape: f32[8,2,8], index: 8, kind: output, shape index: {1}]   ;;  %s2054_s3 = inlined_call_operand.vmem [shape: bf16[16,64], index: 3, kind: input, shape index: {}]   ;;  %s2055_s4 = inlined_call_operand.vmem [shape: bf16[16,32], index: 4, kind: input, shape index: {}]   ;;  %s2056_s5 = inlined_call_operand.vmem [shape: bf16[16,32], index: 5, kind: input, shape index: {}]   ;;  %s2057_s6 = inlined_call_operand.vmem [shape: f32[1,64], index: 6, kind: input, shape index: {}]   ;;  %s2058_s7 = inlined_call_operand.vmem [shape: f32[3,8,32], index: 7, kind: output, shape index: {0}]  }
   0x1   :  { %1438 = vmatprep.subr.bf16.mxu0 %v1604_v0  ;;  %1444 = vmatprep.subr.bf16.mxu1 %v1604_v0  ;;  %v1660_v1 = vld [vmem:[%s2050_s0] sm:$0xff]   ;;  %v1665_v2 = vld [vmem:[%s2050_s0 + $0x8] sm:$0xff]   ;;  %v1683_v5 = vld [vmem:[%s2050_s0 + $0x10] sm:$0xff]   ;;  %v49_v18 = vunpack.c.l.s4 %v1606_v17  ;;  %v51_v19 = vlaneseq  ;;  %v1607_v30 = vmov 0   ;;  %vm569_vm8 = vcmask 59392  }
   0x2   :  { %1440 = vmatprep.mubr.msk.bf16.mxu0 %vm1605_vm0, %v1604_v0  ;;  %1446 = vmatprep.mubr.msk.bf16.mxu1 %vm1605_vm0, %v1604_v0  ;;  %v104_v3 = vld [vmem:[%s2051_s2] sm:$0x3]  ;;  %v105_v4 = vld [vmem:[%s2051_s2 + $0x2] sm:$0x3]  ;;  %v1689_v6 = vld [vmem:[%s2050_s0 + $0x18] sm:$0xff]  }
   0x3   :  { %1439 = vmatpush3.bf16.msra.mxu0 %v1660_v1  ;;  %1445 = vmatpush3.bf16.msra.mxu1 %v1665_v2  ;;  %v106_v7 = vld [vmem:[%s2051_s2 + $0x4] sm:$0x3]  ;;  %v107_v9 = vld [vmem:[%s2051_s2 + $0x6] sm:$0x3]  ;;  %v1715_v10 = vld [vmem:[%s2050_s0 + $0x28] sm:$0xff]   ;;  %v50_v20 = vunpack.c.0.s8 %v49_v18  ;;  %v52_v21 = vshrl.u32 %v51_v19, 7 }
   0x4   :  { %1450 = vmatprep.subr.bf16.mxu0 %v1604_v0  ;;  %1456 = vmatprep.subr.bf16.mxu1 %v1604_v0  ;;  %v1707_v8 = vld [vmem:[%s2050_s0 + $0x20] sm:$0xff]   ;;  %v108_v11 = vld [vmem:[%s2051_s2 + $0x8] sm:$0x3]  ;;  %v1733_v12 = vld [vmem:[%s2050_s0 + $0x30] sm:$0xff]  }
   0x5   :  { %v109_v13 = vld [vmem:[%s2051_s2 + $0xa] sm:$0x3]  ;;  %v1741_v14 = vld [vmem:[%s2050_s0 + $0x38] sm:$0xff]   ;;  %v110_v15 = vld [vmem:[%s2051_s2 + $0xc] sm:$0x3]  ;;  %v53_v22 = vsub.s32 %v50_v20, %v52_v21  ;;  %v1774_v29 = vsub.s32 0, %v52_v21 }
   0x6   :  { %1441 = vmatmul.mubr.msk.bf16.vlgmr.msra.gmra.mxu0 %vm118_vm1, %v104_v3  ;;  %1447 = vmatmul.mubr.msk.bf16.vlgmr.msra.gmra.mxu1 %vm118_vm1, %v105_v4  ;;  %v111_v16 = vld [vmem:[%s2051_s2 + $0xe] sm:$0x3]  ;;  %v45_v23 = vld [vmem:[%s2052_s1] sm:$0xff] }
   0x7   :  { %1451 = vmatpush3.bf16.msra.mxu0 %v1683_v5  ;;  %1457 = vmatpush3.bf16.msra.mxu1 %v1689_v6  ;;  %v54_v24 = vrot.slane %v45_v23, %v53_v22  ;;  %v47_v28 = vcombine.high %v45_v23, %v45_v23 }
   0x8   :  { %1452 = vmatprep.mubr.msk.bf16.mxu0 %vm1605_vm0, %v1604_v0  ;;  %1458 = vmatprep.mubr.msk.bf16.mxu1 %vm1605_vm0, %v1604_v0 }
   0x9   :  { %1462 = vmatprep.subr.bf16.mxu0 %v1604_v0  ;;  %1468 = vmatprep.subr.bf16.mxu1 %v1604_v0  ;;  %v62_v25 = vcombine.high %v54_v24, %v54_v24  ;;  %v1768_v26 = vrot.slane %v54_v24, %v53_v22  ;;  %v61_v35 = vrot.slane %v47_v28, %v53_v22 }
   0xb   :  { %v1770_v27 = vrot.slane %v62_v25, %v53_v22  ;;  %vm505_vm2 = vcmp.gt.f32.partialorder %v1768_v26, 0.0  ;;  %v1780_v33 = vcombine.high %v1768_v26, %v1768_v26  ;;  %v63_v38 = vcombine.high %v61_v35, %v61_v35 }
   0xc   :  { %v513_v31 = vsel %vm505_vm2, 1, %v1607_v30  ;;  %v1792_v42 = vrot.slane %v61_v35, %v53_v22 }
   0xd   :  { %vm506_vm3 = vcmp.gt.f32.partialorder %v1770_v27, 0.0  ;;  %v1784_v34 = vcombine.high %v1770_v27, %v1770_v27  ;;  %v524_v36 = vrot.slane %v513_v31, %v1774_v29  ;;  %vm507_vm4 = vcmp.gt.f32.partialorder %v1780_v33, 0.0 }
   0xe   :  { %1453 = vmatmul.mubr.msk.bf16.vlgmr.msra.gmra.mxu0 %vm118_vm1, %v106_v7  ;;  %1459 = vmatmul.mubr.msk.bf16.vlgmr.msra.gmra.mxu1 %vm118_vm1, %v107_v9  ;;  %v514_v32 = vsel %vm506_vm3, 1, %v1607_v30  ;;  %v515_v39 = vsel %vm507_vm4, 1, %v1607_v30  ;;  %v1796_v45 = vrot.slane %v63_v38, %v53_v22  ;;  %vm509_vm9 = vcmp.gt.f32.partialorder %v1792_v42, 0.0 }
   0xf   :  { %1463 = vmatpush3.bf16.msra.mxu0 %v1707_v8  ;;  %1469 = vmatpush3.bf16.msra.mxu1 %v1715_v10  ;;  %v528_v37 = vrot.slane %v514_v32, %v1774_v29  ;;  %vm508_vm5 = vcmp.gt.f32.partialorder %v1784_v34, 0.0  ;;  %vm553_vm6 = vcmp.eq.s32.totalorder %v524_v36, 1  ;;  %v532_v49 = vrot.slane %v515_v39, %v1774_v29 }
  0x10   :  { %1464 = vmatprep.mubr.msk.bf16.mxu0 %vm1605_vm0, %v1604_v0  ;;  %1470 = vmatprep.mubr.msk.bf16.mxu1 %vm1605_vm0, %v1604_v0  ;;  %v516_v41 = vsel %vm508_vm5, 1, %v1607_v30  ;;  %vm510_vm10 = vcmp.gt.f32.partialorder %v1796_v45, 0.0  ;;  %v517_v57 = vsel %vm509_vm9, 1, %v1607_v30  ;;  %v1812_v60 = vcombine.high %v1792_v42, %v1792_v42 }
  0x11   :  { %1474 = vmatprep.subr.bf16.mxu0 %v1604_v0  ;;  %1480 = vmatprep.subr.bf16.mxu1 %v1604_v0  ;;  %vm554_vm7 = vcmp.eq.s32.totalorder %v528_v37, 1  ;;  %v536_v51 = vrot.slane %v516_v41, %v1774_v29  ;;  %vm555_vm11 = vcmp.eq.s32.totalorder %v532_v49, 1  ;;  %v518_v59 = vsel %vm510_vm10, 1, %v1607_v30 }
  0x12   :  { %v1818_v63 = vcombine.high %v1796_v45, %v1796_v45  ;;  %v540_v9 = vrot.slane %v517_v57, %v1774_v29  ;;  %vm511_vm13 = vcmp.gt.f32.partialorder %v1812_v60, 0.0  ;;  %vm722_vm5 = vcmask 64512  }
  0x13   :  { %vm556_vm12 = vcmp.eq.s32.totalorder %v536_v51, 1  ;;  %v519_v20 = vsel %vm511_vm13, 1, %v1607_v30  ;;  %vm1131_vm9 = vcmask 1043459   ;;  %vm1134_vm10 = vcmask 1044484  }
  0x14   :  { %vm512_vm14 = vcmp.gt.f32.partialorder %v1818_v63, 0.0  ;;  %vm557_vm15 = vcmp.eq.s32.totalorder %v540_v9, 1  ;;  %v548_v32 = vrot.slane %v519_v20, %v1774_v29  ;;  %vm1143_vm13 = vcmask 1047559  }
  0x15   :  { %v520_v22 = vsel %vm512_vm14, 1, %v1607_v30  ;;  %vm1329_vm14 = vcmask 261120  }
  0x16   :  { %1465 = vmatmul.mubr.msk.bf16.vlgmr.msra.gmra.mxu0 %vm118_vm1, %v108_v11  ;;  %1471 = vmatmul.mubr.msk.bf16.vlgmr.msra.gmra.mxu1 %vm118_vm1, %v109_v13  ;;  %v544_v13 = vrot.slane %v518_v59, %v1774_v29  ;;  %v552_v37 = vrot.slane %v520_v22, %v1774_v29  ;;  %vm559_vm3 = vcmp.eq.s32.totalorder %v548_v32, 1 }
  0x17   :  { %1475 = vmatpush3.bf16.msra.mxu0 %v1733_v12  ;;  %1481 = vmatpush3.bf16.msra.mxu1 %v1741_v14 }
  0x18   :  { %1476 = vmatprep.mubr.msk.bf16.mxu0 %vm1605_vm0, %v1604_v0  ;;  %1482 = vmatprep.mubr.msk.bf16.mxu1 %vm1605_vm0, %v1604_v0  ;;  %vm558_vm2 = vcmp.eq.s32.totalorder %v544_v13, 1  ;;  %vm560_vm4 = vcmp.eq.s32.totalorder %v552_v37, 1 }
  0x19   :  { %1486 = vmatprep.subr.bf16.mxu0 %v1604_v0  ;;  %1492 = vmatprep.subr.bf16.mxu1 %v1604_v0 }
  0x1e   :  { %1477 = vmatmul.mubr.msk.bf16.vlgmr.msra.gmra.mxu0 %vm118_vm1, %v110_v15  ;;  %1483 = vmatmul.mubr.msk.bf16.vlgmr.msra.gmra.mxu1 %vm118_vm1, %v111_v16 }
  0x1f   :  { %1488 = vmatprep.mubr.msk.bf16.mxu0 %vm1605_vm0, %v1604_v0  ;;  %1494 = vmatprep.mubr.msk.bf16.mxu1 %vm1605_vm0, %v1604_v0 }
  0xc6   :  { %v156_v40 = vpop.f32.mrf.mxu0  ;;  %v205_v44 = vpop.f32.mrf.mxu1 }
  0xc7   :  { %v1794_v43 = vsel %vm553_vm6, %v156_v40, -1e+30  ;;  %v1798_v46 = vsel %vm554_vm7, %v205_v44, -1e+30  ;;  %vm1350_vm6 = vcmask 58368   ;;  %vm1126_vm7 = vcmask 1041409  }
  0xc8   :  { %v1442_v47 = vpop.f32.mrf.mxu0  ;;  %v570_v48 = vsel %vm569_vm8, %v1794_v43, -inf  ;;  %v1448_v50 = vpop.f32.mrf.mxu1  ;;  %v573_v53 = vsel %vm569_vm8, %v1798_v46, -inf }
  0xc9   :  { %571 = vmax.xlane.f32.xlu0 %v570_v48 }
  0xca   :  { %v159_v52 = vpop.f32.mrf.mxu0  ;;  %v208_v54 = vpop.f32.mrf.mxu1 }
  0xcc   :  { %v1443_v55 = vpop.f32.mrf.mxu0  ;;  %v1449_v56 = vpop.f32.mrf.mxu1 }
  0xcd   :  { %574 = vmax.xlane.f32.xlu0 %v573_v53 }
  0xce   :  { %v254_v58 = vpop.f32.mrf.mxu0  ;;  %v303_v62 = vpop.f32.mrf.mxu1 }
  0xcf   :  { %v1814_v61 = vsel %vm555_vm11, %v254_v58, -1e+30  ;;  %v1820_v3 = vsel %vm556_vm12, %v303_v62, -1e+30  ;;  %vm1137_vm11 = vcmask 1045509   ;;  %vm1140_vm12 = vcmask 1046534  }
  0xd0   :  { %v1454_v4 = vpop.f32.mrf.mxu0  ;;  %v576_v7 = vsel %vm569_vm8, %v1814_v61, -inf  ;;  %v1460_v11 = vpop.f32.mrf.mxu1  ;;  %v579_v16 = vsel %vm569_vm8, %v1820_v3, -inf }
  0xd1   :  { %577 = vmax.xlane.f32.xlu1 %v576_v7 }
  0xd2   :  { %v257_v15 = vpop.f32.mrf.mxu0  ;;  %v306_v17 = vpop.f32.mrf.mxu1 }
  0xd4   :  { %v1455_v18 = vpop.f32.mrf.mxu0  ;;  %v1461_v19 = vpop.f32.mrf.mxu1 }
  0xd5   :  { %580 = vmax.xlane.f32.xlu1 %v579_v16  ;;  %v621_v18 = vrot.slane %v1768_v26, %v1774_v29 }
  0xd6   :  { %v352_v21 = vpop.f32.mrf.mxu0  ;;  %v401_v24 = vpop.f32.mrf.mxu1 }
  0xd7   :  { %v565_v23 = vsel %vm557_vm15, %v352_v21, -1e+30  ;;  %v566_v25 = vsel %vm558_vm2, %v401_v24, -1e+30 }
  0xd8   :  { %v1466_v28 = vpop.f32.mrf.mxu0  ;;  %v582_v31 = vsel %vm569_vm8, %v565_v23, -inf  ;;  %v1472_v35 = vpop.f32.mrf.mxu1  ;;  %v585_v36 = vsel %vm569_vm8, %v566_v25, -inf }
  0xd9   :  { %583 = vmax.xlane.f32.xlu0 %v582_v31  ;;  %586 = vmax.xlane.f32.xlu1 %v585_v36 }
  0xda   :  { %v355_v38 = vpop.f32.mrf.mxu0  ;;  %v404_v39 = vpop.f32.mrf.mxu1 }
  0xdc   :  { %v1467_v40 = vpop.f32.mrf.mxu0  ;;  %v1473_v30 = vpop.f32.mrf.mxu1 }
  0xdd   :  { %v633_v40 = vrot.slane %v1784_v34, %v1774_v29 }
  0xde   :  { %v450_v41 = vpop.f32.mrf.mxu0  ;;  %v499_v47 = vpop.f32.mrf.mxu1 }
  0xdf   :  { %v567_v44 = vsel %vm559_vm3, %v450_v41, -1e+30  ;;  %v568_v48 = vsel %vm560_vm4, %v499_v47, -1e+30  ;;  %v637_v47 = vrot.slane %v1792_v42, %v1774_v29  ;;  %v645_v42 = vrot.slane %v1812_v60, %v1774_v29 }
  0xe0   :  { %v1478_v49 = vpop.f32.mrf.mxu0  ;;  %v588_v50 = vsel %vm569_vm8, %v567_v44, -inf  ;;  %v1484_v51 = vpop.f32.mrf.mxu1  ;;  %v591_v52 = vsel %vm569_vm8, %v568_v48, -inf }
  0xe1   :  { %589 = vmax.xlane.f32.xlu0 %v588_v50  ;;  %592 = vmax.xlane.f32.xlu1 %v591_v52 }
  0xe2   :  { %v453_v53 = vpop.f32.mrf.mxu0  ;;  %v502_v54 = vpop.f32.mrf.mxu1 }
  0xe4   :  { %v1479_v55 = vpop.f32.mrf.mxu0  ;;  %v1485_v56 = vpop.f32.mrf.mxu1 }
 0x152   :  { %v572_v57 = vpop.xlane.xlu0 %571 }
 0x153   :  { %v594_v58 = vsub.f32 %v1794_v43, %v572_v57 }
 0x155   :  { %v602_v59 = vmul.f32 1.442695, %v594_v58 }
 0x156   :  { %v575_v62 = vpop.xlane.xlu0 %574 }
 0x157   :  { %1570 = vpow2.f32 %v602_v59  ;;  %v595_v4 = vsub.f32 %v1798_v46, %v575_v62  ;;  %v727_v62 = vsel %vm722_vm5, %v1660_v1, 0 }
 0x158   :  { %1487 = vmatpush3.bf16.xpose.msra.mxu0 %v727_v62 }
 0x159   :  { %v604_v7 = vmul.f32 1.442695, %v595_v4  ;;  %1498 = vmatprep.subr.bf16.mxu0 %v1604_v0 }
 0x15a   :  { %v578_v9 = vpop.xlane.xlu1 %577 }
 0x15b   :  { %1572 = vpow2.f32 %v604_v7  ;;  %v596_v11 = vsub.f32 %v1814_v61, %v578_v9  ;;  %v625_v61 = vrot.slane %v1770_v27, %v1774_v29 }
 0x15d   :  { %v606_v13 = vmul.f32 1.442695, %v596_v11 }
 0x15e   :  { %v581_v15 = vpop.xlane.xlu1 %580 }
 0x15f   :  { %1574 = vpow2.f32 %v606_v13  ;;  %v597_v16 = vsub.f32 %v1820_v3, %v581_v15 }
 0x161   :  { %v608_v17 = vmul.f32 1.442695, %v597_v16 }
 0x162   :  { %v584_v43 = vpop.xlane.xlu0 %583  ;;  %v587_v19 = vpop.xlane.xlu1 %586 }
 0x163   :  { %1576 = vpow2.f32 %v608_v17  ;;  %v598_v20 = vsub.f32 %v565_v23, %v584_v43  ;;  %v599_v46 = vsub.f32 %v566_v25, %v587_v19  ;;  %v629_v23 = vrot.slane %v1780_v33, %v1774_v29 }
 0x164   :  { %v1571_v21 = vpop.eup %1570 }
 0x165   :  { %v610_v22 = vmul.f32 1.442695, %v598_v20  ;;  %v1844_v24 = vmul.f32 %v1571_v21, %v621_v18  ;;  %v612_v28 = vmul.f32 1.442695, %v599_v46  ;;  %v819_v21 = vsel %vm722_vm5, %v1683_v5, 0 }
 0x167   :  { %1578 = vpow2.f32 %v610_v22  ;;  %v666_v3 = vsel %vm569_vm8, %v1844_v24, 0.0 }
 0x168   :  { %v1573_v31 = vpop.eup %1572  ;;  %1580 = vpow2.f32 %v612_v28  ;;  %667 = vadd.xlane.f32.xlu0 %v666_v3 }
 0x169   :  { %v1850_v26 = vmul.f32 %v1573_v31, %v625_v61  ;;  %v865_v61 = vsel %vm722_vm5, %v1689_v6, 0  ;;  %v911_v6 = vsel %vm722_vm5, %v1707_v8, 0  ;;  %v957_v8 = vsel %vm722_vm5, %v1715_v10, 0 }
 0x16a   :  { %v590_v25 = vpop.xlane.xlu0 %589  ;;  %v593_v32 = vpop.xlane.xlu1 %592  ;;  %v1003_v10 = vsel %vm722_vm5, %v1733_v12, 0 }
 0x16b   :  { %v600_v35 = vsub.f32 %v567_v44, %v590_v25  ;;  %v669_v36 = vsel %vm569_vm8, %v1850_v26, 0.0  ;;  %v601_v37 = vsub.f32 %v568_v48, %v593_v32  ;;  %v641_v48 = vrot.slane %v1796_v45, %v1774_v29 }
 0x16c   :  { %v1575_v27 = vpop.eup %1574  ;;  %670 = vadd.xlane.f32.xlu1 %v669_v36  ;;  %v649_v45 = vrot.slane %v1818_v63, %v1774_v29  ;;  %v773_v29 = vsel %vm722_vm5, %v1665_v2, 0 }
 0x16d   :  { %v614_v38 = vmul.f32 1.442695, %v600_v35  ;;  %v1856_v39 = vmul.f32 %v1575_v27, %v629_v23  ;;  %v616_v30 = vmul.f32 1.442695, %v601_v37  ;;  %1493 = vmatpush3.bf16.xpose.msra.mxu1 %v773_v29 }
 0x16e   :  { %1504 = vmatprep.subr.bf16.mxu1 %v1604_v0 }
 0x16f   :  { %1582 = vpow2.f32 %v614_v38  ;;  %v672_v33 = vsel %vm569_vm8, %v1856_v39, 0.0 }
 0x170   :  { %v1577_v41 = vpop.eup %1576  ;;  %1584 = vpow2.f32 %v616_v30  ;;  %673 = vadd.xlane.f32.xlu0 %v672_v33  ;;  %v1049_v33 = vsel %vm722_vm5, %v1741_v14, 0 }
 0x171   :  { %v1862_v44 = vmul.f32 %v1577_v41, %v633_v40 }
 0x173   :  { %v675_v49 = vsel %vm569_vm8, %v1862_v44, 0.0 }
 0x174   :  { %v1579_v34 = vpop.eup %1578  ;;  %676 = vadd.xlane.f32.xlu1 %v675_v49  ;;  %v1567_v49 = vld [vmem:[%s2054_s3] sm:$0xff]  }
 0x175   :  { %v1581_v50 = vpop.eup %1580  ;;  %v1870_v51 = vmul.f32 %v1579_v34, %v637_v47  ;;  %v1568_v34 = vld [vmem:[%s2055_s4] sm:$0xff]  }
 0x176   :  { %v1872_v52 = vmul.f32 %v1581_v50, %v641_v48 }
 0x177   :  { %v678_v53 = vsel %vm569_vm8, %v1870_v51, 0.0 }
 0x178   :  { %v681_v54 = vsel %vm569_vm8, %v1872_v52, 0.0  ;;  %679 = vadd.xlane.f32.xlu0 %v678_v53 }
 0x179   :  { %682 = vadd.xlane.f32.xlu1 %v681_v54 }
 0x17c   :  { %v1583_v55 = vpop.eup %1582 }
 0x17d   :  { %v1585_v56 = vpop.eup %1584  ;;  %v1882_v57 = vmul.f32 %v1583_v55, %v645_v42 }
 0x17e   :  { %v1884_v58 = vmul.f32 %v1585_v56, %v649_v45 }
 0x17f   :  { %v684_v59 = vsel %vm569_vm8, %v1882_v57, 0.0 }
 0x180   :  { %v687_v4 = vsel %vm569_vm8, %v1884_v58, 0.0  ;;  %685 = vadd.xlane.f32.xlu0 %v684_v59  ;;  %vm1128_vm8 = vcmask 1042434  }
 0x181   :  { %688 = vadd.xlane.f32.xlu1 %v687_v4 }
 0x1f1   :  { %v668_v60 = vpop.xlane.xlu0 %667 }
 0x1f2   :  { %v690_v63 = vmax.f32 %v668_v60, 1e-30 }
 0x1f4   :  { %1586 = vrcp.f32 %v690_v63 }
 0x1f5   :  { %v671_v7 = vpop.xlane.xlu1 %670 }
 0x1f6   :  { %v691_v9 = vmax.f32 %v671_v7, 1e-30 }
 0x1f8   :  { %1588 = vrcp.f32 %v691_v9 }
 0x1f9   :  { %v674_v1 = vpop.xlane.xlu0 %673 }
 0x1fa   :  { %v692_v11 = vmax.f32 %v674_v1, 1e-30 }
 0x1fc   :  { %1590 = vrcp.f32 %v692_v11 }
 0x1fd   :  { %v677_v13 = vpop.xlane.xlu1 %676 }
 0x1fe   :  { %v693_v15 = vmax.f32 %v677_v13, 1e-30 }
 0x200   :  { %1592 = vrcp.f32 %v693_v15 }
 0x201   :  { %v1587_v16 = vpop.eup %1586  ;;  %v680_v17 = vpop.xlane.xlu0 %679 }
 0x202   :  { %v683_v18 = vpop.xlane.xlu1 %682  ;;  %v694_v2 = vmax.f32 %v680_v17, 1e-30  ;;  %v699_v43 = vmul.f32 %v1587_v16, %v1844_v24 }
 0x203   :  { %v695_v19 = vmax.f32 %v683_v18, 1e-30 }
 0x204   :  { %1594 = vrcp.f32 %v694_v2  ;;  %v714_v20 = vpack.c.bf16 %v699_v43, %v699_v43  ;;  %1351 = vst.msk [vmem:[%s2053_s8] sm:$0x3] %vm1350_vm6, %v699_v43 }
 0x205   :  { %v1589_v46 = vpop.eup %1588  ;;  %1596 = vrcp.f32 %v695_v19 }
 0x206   :  { %1489 = vmatmul.mubr.msk.bf16.vlgmr.msra.gmra.mxu0 %vm722_vm5, %v714_v20  ;;  %v701_v22 = vmul.f32 %v1589_v46, %v1850_v26 }
 0x207   :  { %1499 = vmatpush3.bf16.xpose.msra.mxu0 %v819_v21  ;;  %1500 = vmatprep.mubr.msk.bf16.mxu0 %vm1605_vm0, %v1604_v0 }
 0x208   :  { %v715_v24 = vpack.c.bf16 %v701_v22, %v701_v22  ;;  %1352 = vst.msk [vmem:[%s2053_s8 + $0x2] sm:$0x3] %vm1350_vm6, %v701_v22  ;;  %1510 = vmatprep.subr.bf16.mxu0 %v1604_v0 }
 0x209   :  { %v1591_v5 = vpop.eup %1590  ;;  %v686_v28 = vpop.xlane.xlu0 %685 }
 0x20a   :  { %v689_v3 = vpop.xlane.xlu1 %688  ;;  %v696_v31 = vmax.f32 %v686_v28, 1e-30  ;;  %1495 = vmatmul.mubr.msk.bf16.vlgmr.msra.gmra.mxu1 %vm722_vm5, %v715_v24  ;;  %v703_v26 = vmul.f32 %v1591_v5, %v1856_v39 }
 0x20b   :  { %v697_v23 = vmax.f32 %v689_v3, 1e-30  ;;  %1505 = vmatpush3.bf16.xpose.msra.mxu1 %v865_v61  ;;  %1506 = vmatprep.mubr.msk.bf16.mxu1 %vm1605_vm0, %v1604_v0 }
 0x20c   :  { %1598 = vrcp.f32 %v696_v31  ;;  %v716_v25 = vpack.c.bf16 %v703_v26, %v703_v26  ;;  %1353 = vst.msk [vmem:[%s2053_s8 + $0x4] sm:$0x3] %vm1350_vm6, %v703_v26  ;;  %1516 = vmatprep.subr.bf16.mxu1 %v1604_v0 }
 0x20d   :  { %v1593_v32 = vpop.eup %1592  ;;  %1600 = vrcp.f32 %v697_v23 }
 0x20e   :  { %1501 = vmatmul.mubr.msk.bf16.vlgmr.msra.gmra.mxu0 %vm722_vm5, %v716_v25  ;;  %v705_v35 = vmul.f32 %v1593_v32, %v1862_v44 }
 0x20f   :  { %1511 = vmatpush3.bf16.xpose.msra.mxu0 %v911_v6  ;;  %1512 = vmatprep.mubr.msk.bf16.mxu0 %vm1605_vm0, %v1604_v0 }
 0x210   :  { %v717_v36 = vpack.c.bf16 %v705_v35, %v705_v35  ;;  %1354 = vst.msk [vmem:[%s2053_s8 + $0x6] sm:$0x3] %vm1350_vm6, %v705_v35  ;;  %1522 = vmatprep.subr.bf16.mxu0 %v1604_v0 }
 0x211   :  { %v1595_v27 = vpop.eup %1594 }
 0x212   :  { %v1597_v37 = vpop.eup %1596  ;;  %1507 = vmatmul.mubr.msk.bf16.vlgmr.msra.gmra.mxu1 %vm722_vm5, %v717_v36  ;;  %v707_v38 = vmul.f32 %v1595_v27, %v1870_v51 }
 0x213   :  { %1517 = vmatpush3.bf16.xpose.msra.mxu1 %v957_v8  ;;  %1518 = vmatprep.mubr.msk.bf16.mxu1 %vm1605_vm0, %v1604_v0  ;;  %v709_v39 = vmul.f32 %v1597_v37, %v1872_v52 }
 0x214   :  { %v718_v40 = vpack.c.bf16 %v707_v38, %v707_v38  ;;  %1355 = vst.msk [vmem:[%s2053_s8 + $0x8] sm:$0x3] %vm1350_vm6, %v707_v38  ;;  %1528 = vmatprep.subr.bf16.mxu1 %v1604_v0 }
 0x215   :  { %1356 = vst.msk [vmem:[%s2053_s8 + $0xa] sm:$0x3] %vm1350_vm6, %v709_v39  ;;  %v719_v30 = vpack.c.bf16 %v709_v39, %v709_v39 }
 0x216   :  { %1513 = vmatmul.mubr.msk.bf16.vlgmr.msra.gmra.mxu0 %vm722_vm5, %v718_v40 }
 0x217   :  { %1523 = vmatpush3.bf16.xpose.msra.mxu0 %v1003_v10  ;;  %1524 = vmatprep.mubr.msk.bf16.mxu0 %vm1605_vm0, %v1604_v0 }
 0x218   :  { %1534 = vmatprep.subr.bf16.mxu0 %v1604_v0 }
 0x219   :  { %v1599_v12 = vpop.eup %1598 }
 0x21a   :  { %v1601_v41 = vpop.eup %1600  ;;  %1519 = vmatmul.mubr.msk.bf16.vlgmr.msra.gmra.mxu1 %vm722_vm5, %v719_v30  ;;  %v711_v44 = vmul.f32 %v1599_v12, %v1882_v57 }
 0x21b   :  { %1529 = vmatpush3.bf16.xpose.msra.mxu1 %v1049_v33  ;;  %1530 = vmatprep.mubr.msk.bf16.mxu1 %vm1605_vm0, %v1604_v0  ;;  %v713_v47 = vmul.f32 %v1601_v41, %v1884_v58 }
 0x21c   :  { %v720_v48 = vpack.c.bf16 %v711_v44, %v711_v44  ;;  %1357 = vst.msk [vmem:[%s2053_s8 + $0xc] sm:$0x3] %vm1350_vm6, %v711_v44  ;;  %1540 = vmatprep.subr.bf16.mxu1 %v1604_v0 }
 0x21d   :  { %1358 = vst.msk [vmem:[%s2053_s8 + $0xe] sm:$0x3] %vm1350_vm6, %v713_v47  ;;  %v721_v14 = vpack.c.bf16 %v713_v47, %v713_v47 }
 0x21e   :  { %1525 = vmatmul.mubr.msk.bf16.vlgmr.msra.gmra.mxu0 %vm722_vm5, %v720_v48 }
 0x21f   :  { %1536 = vmatprep.mubr.msk.bf16.mxu0 %vm1605_vm0, %v1604_v0  ;;  %1535 = vmatpush3.bf16.msra.mxu0 %v1567_v49 }
 0x220   :  { %1546 = vmatprep.subr.bf16.mxu0 %v1604_v0 }
 0x222   :  { %1531 = vmatmul.mubr.msk.bf16.vlgmr.msra.gmra.mxu1 %vm722_vm5, %v721_v14 }
 0x223   :  { %1542 = vmatprep.mubr.msk.bf16.mxu1 %vm1605_vm0, %v1604_v0  ;;  %1541 = vmatpush3.bf16.msra.mxu1 %v1568_v34 }
 0x2c6   :  { %v763_v50 = vpop.f32.mrf.mxu0 }
 0x2c7   :  { %v1091_v7 = vpack.c.bf16 %v763_v50, %v763_v50 }
 0x2c8   :  { %v1490_v51 = vpop.f32.mrf.mxu0 }
 0x2c9   :  { %v1116_v2 = vunpack.c.l.b16 %v1091_v7 }
 0x2ca   :  { %v766_v52 = vpop.f32.mrf.mxu0  ;;  %v809_v53 = vpop.f32.mrf.mxu1 }
 0x2cb   :  { %v1092_v29 = vpack.c.bf16 %v809_v53, %v809_v53  ;;  %v1124_v28 = vrot.slane %v1116_v2, 2  ;;  %v1263_v49 = vrot.slane %v1116_v2, 1 }
 0x2cc   :  { %v1491_v54 = vpop.f32.mrf.mxu0  ;;  %v1496_v42 = vpop.f32.mrf.mxu1 }
 0x2cd   :  { %v1985_v13 = vunpack.c.l.b16 %v1092_v29 }
 0x2ce   :  { %v812_v45 = vpop.f32.mrf.mxu1  ;;  %v855_v55 = vpop.f32.mrf.mxu0 }
 0x2cf   :  { %v1093_v9 = vpack.c.bf16 %v855_v55, %v855_v55  ;;  %v1125_v46 = vrot.slane %v1985_v13, 1  ;;  %v1197_v3 = vrot.slane %v1985_v13, 7 }
 0x2d0   :  { %v1497_v56 = vpop.f32.mrf.mxu1  ;;  %v1502_v57 = vpop.f32.mrf.mxu0 }
 0x2d1   :  { %v1987_v19 = vunpack.c.l.b16 %v1093_v9  ;;  %v1127_v32 = vsel %vm1126_vm7, %v1125_v46, %v1124_v28  ;;  %v1198_v40 = vsel %vm1126_vm7, %v1197_v3, %v1116_v2  ;;  %v1391_v46 = vld [vmem:[%s2057_s6] ss:$0 sm:$0xff]  ;;  %s1608_s6 = smov 32  }
 0x2d2   :  { %v858_v58 = vpop.f32.mrf.mxu0  ;;  %v901_v59 = vpop.f32.mrf.mxu1 }
 0x2d3   :  { %v1094_v15 = vpack.c.bf16 %v901_v59, %v901_v59  ;;  %v1199_v23 = vrot.slane %v1987_v19, 6  ;;  %v1129_v12 = vsel %vm1128_vm8, %v1987_v19, %v1127_v32  ;;  %v1265_v52 = vrot.slane %v1987_v19, 7 }
 0x2d4   :  { %v1503_v62 = vpop.f32.mrf.mxu0  ;;  %v1508_v4 = vpop.f32.mrf.mxu1 }
 0x2d5   :  { %v1990_v22 = vunpack.c.l.b16 %v1094_v15  ;;  %v1200_v41 = vsel %vm1128_vm8, %v1199_v23, %v1198_v40 }
 0x2d6   :  { %v904_v60 = vpop.f32.mrf.mxu1  ;;  %v947_v63 = vpop.f32.mrf.mxu0 }
 0x2d7   :  { %v1095_v16 = vpack.c.bf16 %v947_v63, %v947_v63  ;;  %v1130_v35 = vrot.slane %v1990_v22, 7  ;;  %v1201_v36 = vrot.slane %v1990_v22, 5  ;;  %v1267_v53 = vrot.slane %v1990_v22, 6 }
 0x2d8   :  { %v1509_v1 = vpop.f32.mrf.mxu1  ;;  %v1514_v11 = vpop.f32.mrf.mxu0  ;;  %v1264_v60 = vsel %vm1126_vm7, %v1985_v13, %v1263_v49 }
 0x2d9   :  { %v1992_v24 = vunpack.c.l.b16 %v1095_v16  ;;  %v1132_v34 = vsel %vm1131_vm9, %v1130_v35, %v1129_v12  ;;  %v1202_v50 = vsel %vm1131_vm9, %v1201_v36, %v1200_v41  ;;  %v1569_v1 = vld [vmem:[%s2056_s5] sm:$0xff]   ;;  %v1266_v11 = vsel %vm1128_vm8, %v1265_v52, %v1264_v60 }
 0x2da   :  { %v950_v17 = vpop.f32.mrf.mxu0  ;;  %v993_v18 = vpop.f32.mrf.mxu1 }
 0x2db   :  { %v1096_v43 = vpack.c.bf16 %v993_v18, %v993_v18  ;;  %v1133_v27 = vrot.slane %v1992_v24, 6  ;;  %v1203_v37 = vrot.slane %v1992_v24, 4  ;;  %v1269_v59 = vrot.slane %v1992_v24, 5 }
 0x2dc   :  { %v1515_v20 = vpop.f32.mrf.mxu0  ;;  %v1520_v21 = vpop.f32.mrf.mxu1  ;;  %v1268_v18 = vsel %vm1131_vm9, %v1267_v53, %v1266_v11 }
 0x2dd   :  { %v1121_v31 = vunpack.c.l.b16 %v1096_v43  ;;  %v1135_v54 = vsel %vm1134_vm10, %v1133_v27, %v1132_v34  ;;  %v1204_v42 = vsel %vm1134_vm10, %v1203_v37, %v1202_v50  ;;  %v1270_v43 = vsel %vm1134_vm10, %v1269_v59, %v1268_v18 }
 0x2de   :  { %v996_v61 = vpop.f32.mrf.mxu1  ;;  %v1039_v5 = vpop.f32.mrf.mxu0 }
 0x2df   :  { %v1097_v26 = vpack.c.bf16 %v1039_v5, %v1039_v5  ;;  %v1136_v10 = vrot.slane %v1121_v31, 5  ;;  %v1205_v30 = vrot.slane %v1121_v31, 3  ;;  %v1271_v63 = vrot.slane %v1121_v31, 4 }
 0x2e0   :  { %v1521_v25 = vpop.f32.mrf.mxu1  ;;  %v1526_v6 = vpop.f32.mrf.mxu0 }
 0x2e1   :  { %v1122_v8 = vunpack.c.l.b16 %v1097_v26  ;;  %v1138_v55 = vsel %vm1137_vm11, %v1136_v10, %v1135_v54  ;;  %v1206_v56 = vsel %vm1137_vm11, %v1205_v30, %v1204_v42  ;;  %v1272_v13 = vsel %vm1137_vm11, %v1271_v63, %v1270_v43 }
 0x2e2   :  { %v1042_v38 = vpop.f32.mrf.mxu0  ;;  %v1085_v39 = vpop.f32.mrf.mxu1 }
 0x2e3   :  { %v1098_v33 = vpack.c.bf16 %v1085_v39, %v1085_v39  ;;  %v1139_v44 = vrot.slane %v1122_v8, 4  ;;  %v1207_v47 = vrot.slane %v1122_v8, 2  ;;  %v1273_v15 = vrot.slane %v1122_v8, 3 }
 0x2e4   :  { %v1527_v48 = vpop.f32.mrf.mxu0  ;;  %v1532_v14 = vpop.f32.mrf.mxu1 }
 0x2e5   :  { %v1123_v51 = vunpack.c.l.b16 %v1098_v33  ;;  %v1141_v62 = vsel %vm1140_vm12, %v1139_v44, %v1138_v55  ;;  %v1208_v4 = vsel %vm1140_vm12, %v1207_v47, %v1206_v56  ;;  %v1274_v19 = vsel %vm1140_vm12, %v1273_v15, %v1272_v13 }
 0x2e6   :  { %v1088_v45 = vpop.f32.mrf.mxu1 }
 0x2e7   :  { %v1142_v57 = vrot.slane %v1123_v51, 3  ;;  %v1209_v58 = vrot.slane %v1123_v51, 1  ;;  %v1275_v2 = vrot.slane %v1123_v51, 2 }
 0x2e8   :  { %v1533_v29 = vpop.f32.mrf.mxu1 }
 0x2e9   :  { %v1144_v7 = vsel %vm1143_vm13, %v1142_v57, %v1141_v62  ;;  %v1210_v9 = vsel %vm1143_vm13, %v1209_v58, %v1208_v4  ;;  %v1276_v20 = vsel %vm1143_vm13, %v1275_v2, %v1274_v19 }
 0x2ea   :  { %v1145_v16 = vpack.c.b16 %v1144_v7, %v1144_v7  ;;  %v1211_v17 = vpack.c.b16 %v1210_v9, %v1210_v9  ;;  %v1277_v21 = vpack.c.b16 %v1276_v20, %v1276_v20 }
 0x2ec   :  { %1537 = vmatmul.mubr.msk.bf16.vlgmr.msra.gmra.mxu0 %vm118_vm1, %v1145_v16  ;;  %1543 = vmatmul.mubr.msk.bf16.vlgmr.msra.gmra.mxu1 %vm118_vm1, %v1211_v17 }
 0x2ed   :  { %1547 = vmatpush3.bf16.msra.mxu0 %v1569_v1  ;;  %1548 = vmatprep.mubr.msk.bf16.mxu0 %vm1605_vm0, %v1604_v0 }
 0x2f4   :  { %1549 = vmatmul.mubr.msk.bf16.vlgmr.msra.gmra.mxu0 %vm118_vm1, %v1277_v21 }
 0x3ac   :  { %v1189_v22 = vpop.f32.mrf.mxu0  ;;  %v1255_v24 = vpop.f32.mrf.mxu1 }
 0x3ad   :  { %v1190_v61 = vadd.f32 %v1391_v46, %v1189_v22  ;;  %1398 = vst.msk [vmem:[%s2058_s7 + $0x8] sm:$0xff] %vm1329_vm14, %v1255_v24 }
 0x3ae   :  { %v1538_v0 = vpop.f32.mrf.mxu0  ;;  %v1544_v5 = vpop.f32.mrf.mxu1 }
 0x3af   :  { %v1327_v28 = vadd.f32 %v1255_v24, %v1190_v61 }
 0x3b0   :  { %v1192_v3 = vpop.f32.mrf.mxu0  ;;  %v1258_v31 = vpop.f32.mrf.mxu1 }
 0x3b1   :  { %v1328_v26 = vmul.f32 %v1327_v28, %v1327_v28 }
 0x3b2   :  { %v1539_v23 = vpop.f32.mrf.mxu0  ;;  %v1545_v25 = vpop.f32.mrf.mxu1 }
 0x3b3   :  { %v1330_v6 = vsel %vm1329_vm14, %v1328_v26, 0.0 }
 0x3b4   :  { %1331 = vadd.xlane.f32.xlu1 %v1330_v6  ;;  %v1321_v32 = vpop.f32.mrf.mxu0 }
 0x3b5   :  { %1337 = vrot.lane.b32.xlu0 %v1321_v32, %s1608_s6 }
 0x3b6   :  { %v1550_v35 = vpop.f32.mrf.mxu0 }
 0x3b8   :  { %v1324_v36 = vpop.f32.mrf.mxu0 }
 0x3ba   :  { %v1551_v8 = vpop.f32.mrf.mxu0 }
 0x427   :  { %v1338_v27 = vpop.permute.xlu0 %1337 }
 0x428   :  { %v1340_v37 = vadd.f32 %v1338_v27, %v1190_v61 }
 0x42a   :  { %1345 = vrot.lane.b32.xlu1 %v1340_v37, %s1609_s13 }
 0x43d   :  { %v1332_v38 = vpop.xlane.xlu1 %1331 }
 0x43e   :  { %v1333_v39 = vadd.f32 1e-12, %v1332_v38 }
 0x440   :  { %1602 = vrsqrt.f32 %v1333_v39 }
 0x44d   :  { %v1603_v40 = vpop.eup %1602 }
 0x44e   :  { %v1335_v10 = vmul.f32 %v1603_v40, %v1327_v28 }
 0x450   :  { %1341 = vst.msk [vmem:[%s2058_s7] sm:$0xff] %vm1329_vm14, %v1335_v10 }
 0x49c   :  { %v1346_v30 = vpop.permute.xlu1 %1345 }
 0x49d   :  { %1399 = vst.msk [vmem:[%s2058_s7 + $0x10] sm:$0xff] %vm1329_vm14, %v1346_v30 }

</bundles_post_ra>
